<compile_context>
chip_gen: v7x
topology: tpu7x:2x2x1
jax: 0.10.0
libtpu: 0.0.40
codegen_flags: <defaults>
</compile_context>

<pallas_src>
import functools

import jax
import jax.numpy as jnp
from jax.experimental import pallas as pl
from jax.experimental.pallas import tpu as pltpu


def _round_up(x, m):
    return ((x + m - 1) // m) * m


def _pad_to(a, shape):
    return jnp.pad(a, [(0, s - d) for d, s in zip(a.shape, shape)])


def _vmem_cap_bytes():
    """Usable per-core VMEM minus headroom; falls back to the v7x 64 MiB figure."""
    try:
        cap = int(pltpu.get_tpu_info().vmem_capacity_bytes)
        return max(cap - (16 << 20), 32 << 20)
    except Exception:  # pragma: no cover - conservative fallback
        return 64 << 20


def _choose_time_tile(L, metas, in_p, out_p, x_itemsize, budget_bytes=4 << 20):
    """Pick TL (multiple of 8, >= max causal pad) from a VMEM byte budget."""
    # Bytes of VMEM held per time row: double-buffered x/out tiles + f32 temporaries.
    row_bytes = 2 * in_p * x_itemsize + 2 * out_p * 4
    for m in metas:
        row_bytes += 4 * (2 * m["cin_p"] + 4 * m["cout_p"])
    tl = max((budget_bytes // max(row_bytes, 1)) // 8 * 8, 8)
    tl = min(tl, 1024, _round_up(L, 8))
    max_pad = max((m["pad"] for m in metas), default=0)
    tl = max(tl, 8, _round_up(max_pad, 8))
    return int(tl)


def _tcn_fused_kernel(*refs, metas, TL, compute_dtype):
    """All TemporalBlocks for one (batch, time-tile) grid cell.

    refs = [x] + per-layer [w1, b1, w2, b2, (wd, bd)?] + [out] + per-layer [x_halo, h_halo].
      x_ref   (1, TL, Cin0_p)   input tile (also the first residual)
      w1/w2   (k, Cin_p, Cout_p) conv weights, tap-major
      b1/b2   (1, Cout_p)       f32 biases
      wd/bd   (Cin_p, Cout_p)/(1, Cout_p)  1x1 downsample (only when Cin != Cout)
      out_ref (1, TL, Cout_last_p)
      x_halo  (pad, Cin_p)  f32  last `pad` rows of this layer's input from the previous tile
      h_halo  (pad, Cout_p) f32  last `pad` rows of this layer's conv1 activation
    """
    f32 = jnp.float32
    n_w = sum(6 if m["has_ds"] else 4 for m in metas)
    x_ref = refs[0]
    w_refs = refs[1:1 + n_w]
    out_ref = refs[1 + n_w]
    scratch = refs[2 + n_w:]

    j = pl.program_id(1)
    act = x_ref[0].astype(f32)            # (TL, Cin0_p) -- read from HBM exactly once

    wi = 0
    si = 0
    for m in metas:
        k, d, pad = m["k"], m["dilation"], m["pad"]
        w1, b1, w2, b2 = w_refs[wi], w_refs[wi + 1], w_refs[wi + 2], w_refs[wi + 3]
        wi += 4
        if m["has_ds"]:
            wd, bd = w_refs[wi], w_refs[wi + 1]
            wi += 2

        if pad > 0:
            xh, hh = scratch[si], scratch[si + 1]
            si += 2

            # The causal left zero-padding lives only in these tiny halo buffers.
            # Zero once per batch element (first time tile); afterwards they carry
            # the previous tile's trailing rows.
            @pl.when(j == 0)
            def _zero_halo(xh=xh, hh=hh):
                xh[...] = jnp.zeros(xh.shape, xh.dtype)
                hh[...] = jnp.zeros(hh.shape, hh.dtype)

        act_c = act.astype(compute_dtype)

        # ---- conv1: per-tap accumulated dots (K = Cin_p >= 128 per tap).  The
        # unshifted tap (t = k-1) comes straight from the in-register activation;
        # shifted taps are (halo ++ act) row concats.  Dropout = identity. ----
        acc = jnp.dot(act_c, w1[k - 1], preferred_element_type=f32)
        for t in range(k - 1):
            hrows = pad - t * d
            tap = jnp.concatenate([xh[t * d:, :], act[:TL - hrows, :]], axis=0)
            acc = acc + jnp.dot(tap.astype(compute_dtype), w1[t],
                                preferred_element_type=f32)
        h = jnp.maximum(acc + b1[...], 0.0)             # bias/ReLU in f32
        h_c = h.astype(compute_dtype)

        # ---- conv2: same structure on the conv1 activation ----
        acc2 = jnp.dot(h_c, w2[k - 1], preferred_element_type=f32)
        for t in range(k - 1):
            hrows = pad - t * d
            tap = jnp.concatenate([hh[t * d:, :], h[:TL - hrows, :]], axis=0)
            acc2 = acc2 + jnp.dot(tap.astype(compute_dtype), w2[t],
                                  preferred_element_type=f32)
        out2 = jnp.maximum(acc2 + b2[...], 0.0)

        # ---- residual: identity when Cin == Cout (downsample=None), else 1x1 conv ----
        if m["has_ds"]:
            res = jnp.dot(act_c, wd[...], preferred_element_type=f32) + bd[...]
        else:
            res = act

        # ---- carry the trailing `pad` rows into the halos for the next time tile ----
        if pad > 0:
            xh[...] = act[TL - pad:, :]
            hh[...] = h[TL - pad:, :]

        act = jnp.maximum(out2 + res, 0.0)

    out_ref[0] = act.astype(out_ref.dtype)


def temporal_conv_net(x_ncl, params, kernel_size,
                      compute_dtype=jnp.bfloat16, time_tile=None):
    """x_ncl: (B, C, L) PyTorch NCL layout -> (B, C_last, L) float32."""
    assert len(params) >= 1
    B, C, L = x_ncl.shape
    k = int(kernel_size)

    metas = []
    cin = C
    for p in params:
        cout = int(p["b1"].shape[-1])
        d = int(p["dilation"])
        metas.append(dict(k=k, dilation=d, pad=(k - 1) * d,
                          cin=cin, cout=cout,
                          cin_p=_round_up(cin, 128), cout_p=_round_up(cout, 128),
                          has_ds=(p["wd"] is not None)))
        cin = cout
    in_p = metas[0]["cin_p"]
    out_c, out_p = metas[-1]["cout"], metas[-1]["cout_p"]
    max_pad = max(m["pad"] for m in metas)

    bf16 = jnp.dtype(compute_dtype) == jnp.dtype(jnp.bfloat16)
    io_dtype = jnp.bfloat16 if bf16 else jnp.float32

    if time_tile is None:
        TL = _choose_time_tile(L, metas, in_p, out_p, jnp.dtype(io_dtype).itemsize)
    else:
        TL = int(time_tile)
    assert TL % 8 == 0 and TL >= max_pad, (TL, max_pad)
    Lp = _round_up(L, TL)
    nL = Lp // TL

    # (B, C, L) -> (B, L, C); zero-pad channels to 128-lane multiples (lane-dense loads/
    # stores + full MXU N/K) and time to a TL multiple (ragged tail sliced off below).
    h = jnp.transpose(x_ncl, (0, 2, 1))
    h = jnp.pad(h, ((0, 0), (0, Lp - L), (0, in_p - C)))
    x_io = h.astype(io_dtype)

    args = [x_io]
    in_specs = [pl.BlockSpec((1, TL, in_p), lambda b, j: (b, j, 0))]
    scratch_shapes = []
    for m, p in zip(metas, params):
        cin_p, cout_p = m["cin_p"], m["cout_p"]
        args += [
            _pad_to(p["w1"], (k, cin_p, cout_p)).astype(compute_dtype),
            _pad_to(p["b1"], (1, cout_p)).astype(jnp.float32),
            _pad_to(p["w2"], (k, cout_p, cout_p)).astype(compute_dtype),
            _pad_to(p["b2"], (1, cout_p)).astype(jnp.float32),
        ]
        in_specs += [
            pl.BlockSpec((k, cin_p, cout_p), lambda b, j: (0, 0, 0)),
            pl.BlockSpec((1, cout_p), lambda b, j: (0, 0)),
            pl.BlockSpec((k, cout_p, cout_p), lambda b, j: (0, 0, 0)),
            pl.BlockSpec((1, cout_p), lambda b, j: (0, 0)),
        ]
        if m["has_ds"]:
            args += [_pad_to(p["wd"], (cin_p, cout_p)).astype(compute_dtype),
                     _pad_to(p["bd"], (1, cout_p)).astype(jnp.float32)]
            in_specs += [pl.BlockSpec((cin_p, cout_p), lambda b, j: (0, 0)),
                         pl.BlockSpec((1, cout_p), lambda b, j: (0, 0))]
        if m["pad"] > 0:
            scratch_shapes += [pltpu.VMEM((m["pad"], cin_p), jnp.float32),
                               pltpu.VMEM((m["pad"], cout_p), jnp.float32)]

    # Advisory cost estimate for the XLA scheduler.
    w_bytes = sum(int(a.size) * a.dtype.itemsize for a in args[1:])
    flops = 0
    for m in metas:
        flops += 2 * B * Lp * k * (m["cin_p"] + m["cout_p"]) * m["cout_p"]
        if m["has_ds"]:
            flops += 2 * B * Lp * m["cin_p"] * m["cout_p"]
    bytes_accessed = (int(x_io.size) * x_io.dtype.itemsize
                      + B * Lp * out_p * 4 + w_bytes)

    # VMEM budget: double-buffered x/out tiles + (double-buffered) weights + halos +
    # per-layer in-kernel temporaries, with margin, capped by the hardware capacity.
    halo_bytes = sum(4 * m["pad"] * (m["cin_p"] + m["cout_p"]) for m in metas)
    tile_bytes = 2 * TL * in_p * jnp.dtype(io_dtype).itemsize + 2 * TL * out_p * 4
    temp_bytes = sum(4 * TL * (2 * m["cin_p"] + 4 * m["cout_p"]) for m in metas)
    est = tile_bytes + 2 * w_bytes + halo_bytes + temp_bytes
    vmem_limit = int(min(max(2 * est, 32 << 20), _vmem_cap_bytes()))

    kernel = functools.partial(_tcn_fused_kernel, metas=tuple(metas), TL=TL,
                               compute_dtype=compute_dtype)

    # NOTE: the per-layer halo carry relies on the grid iterating j (time) innermost and
    # serially per batch element; j == 0 re-zeros the halos, so sharding the 'parallel'
    # batch axis across cores (each core runs full j sweeps with its own scratch) is safe.
    out = pl.pallas_call(
        kernel,
        out_shape=jax.ShapeDtypeStruct((B, Lp, out_p), jnp.float32),
        grid_spec=pltpu.PrefetchScalarGridSpec(
            num_scalar_prefetch=0,
            grid=(B, nL),
            in_specs=in_specs,
            out_specs=pl.BlockSpec((1, TL, out_p), lambda b, j: (b, j, 0)),
            scratch_shapes=scratch_shapes,
        ),
        compiler_params=pltpu.CompilerParams(
            dimension_semantics=("parallel", "arbitrary"),
            vmem_limit_bytes=vmem_limit),
        cost_estimate=pl.CostEstimate(flops=int(flops), transcendentals=0,
                                      bytes_accessed=int(bytes_accessed)),
    )(*args)

    return jnp.transpose(out[:, :L, :out_c], (0, 2, 1))


def init_tcn_params(key, num_inputs, num_channels, kernel_size):
    """Deterministic parameter init (Kaiming-normal weights, small biases)."""
    params = []
    for i, out_c in enumerate(num_channels):
        in_c = num_inputs if i == 0 else num_channels[i - 1]
        key, k1, k2, k3, k4, k5, k6 = jax.random.split(key, 7)
        std1 = (2.0 / (in_c * kernel_size)) ** 0.5
        std2 = (2.0 / (out_c * kernel_size)) ** 0.5
        w1 = jax.random.normal(k1, (kernel_size, in_c, out_c), jnp.float32) * std1
        b1 = jax.random.normal(k2, (1, out_c), jnp.float32) * 0.01
        w2 = jax.random.normal(k3, (kernel_size, out_c, out_c), jnp.float32) * std2
        b2 = jax.random.normal(k4, (1, out_c), jnp.float32) * 0.01
        if in_c != out_c:
            wd = jax.random.normal(k5, (in_c, out_c), jnp.float32) * (2.0 / in_c) ** 0.5
            bd = jax.random.normal(k6, (1, out_c), jnp.float32) * 0.01
        else:  # downsample is None in PyTorch -> exact identity residual (no matmul)
            wd, bd = None, None
        params.append(dict(w1=w1, b1=b1, w2=w2, b2=b2, wd=wd, bd=bd,
                           dilation=2 ** i))
    return params


def _ref_block(x, p, ksize):
    """Pure-JAX reference of one TemporalBlock, (B, L, C) layout."""
    d = p["dilation"]
    pad = (ksize - 1) * d
    L = x.shape[1]
    xp = jnp.pad(x, ((0, 0), (pad, 0), (0, 0)))
    h = sum(xp[:, t * d:t * d + L, :] @ p["w1"][t] for t in range(ksize)) + p["b1"]
    h = jnp.maximum(h, 0.0)
    hp = jnp.pad(h, ((0, 0), (pad, 0), (0, 0)))
    o = sum(hp[:, t * d:t * d + L, :] @ p["w2"][t] for t in range(ksize)) + p["b2"]
    o = jnp.maximum(o, 0.0)
    res = x if p["wd"] is None else x @ p["wd"] + p["bd"]
    return jnp.maximum(o + res, 0.0)


def _ref_tcn(x_ncl, params, ksize):
    h = jnp.transpose(x_ncl, (0, 2, 1))
    for p in params:
        h = _ref_block(h, p, ksize)
    return jnp.transpose(h, (0, 2, 1))


if __name__ == "__main__":
    key = jax.random.PRNGKey(0)
    B, C = 2, 4
    num_channels = (8, 8, 16)   # middle layer has Cin == Cout -> identity residual path
    kernel_size = 2

    kx, kx2, kp = jax.random.split(key, 3)
    params = init_tcn_params(kp, C, num_channels, kernel_size)

    # Tolerances are modest because the pure-JAX reference itself runs at the TPU
    # default matmul precision (bf16 MXU passes) for f32 operands.

    # --- check 1: f32 MXU path, single time tile ---
    x = jax.random.normal(kx, (B, C, 16), jnp.float32)        # PyTorch NCL input
    out = jax.block_until_ready(
        temporal_conv_net(x, params, kernel_size, compute_dtype=jnp.float32))
    ref = _ref_tcn(x, params, kernel_size)
    assert out.shape == (B, num_channels[-1], 16), out.shape
    assert jnp.allclose(out, ref, atol=2e-2, rtol=2e-2), \
        float(jnp.max(jnp.abs(out - ref)))

    # --- check 2: f32, ragged multi-tile time axis (L=50 -> padded to 64, TL=16);
    #     exercises the causal halo carry and the time-padding slice-off ---
    x2 = jax.random.normal(kx2, (B, C, 50), jnp.float32)
    out2 = jax.block_until_ready(
        temporal_conv_net(x2, params, kernel_size, compute_dtype=jnp.float32,
                          time_tile=16))
    ref2 = _ref_tcn(x2, params, kernel_size)
    assert out2.shape == (B, num_channels[-1], 50), out2.shape
    assert jnp.allclose(out2, ref2, atol=2e-2, rtol=2e-2), \
        float(jnp.max(jnp.abs(out2 - ref2)))

    # --- check 3: default bf16-on-MXU path (bf16 HBM input, f32 accumulation) ---
    out_bf16 = jax.block_until_ready(temporal_conv_net(x, params, kernel_size))
    assert out_bf16.shape == (B, num_channels[-1], 16), out_bf16.shape
    assert jnp.allclose(out_bf16, ref, atol=1e-1, rtol=1e-1), \
        float(jnp.max(jnp.abs(out_bf16 - ref)))

    print("KERNEL_OK")
</pallas_src>

<mosaic_0001>
module attributes {stable_mosaic.version = 11 : i64} {
  func.func @_tcn_fused_kernel(%arg0: i32, %arg1: i32, %arg2: memref<1x16x128xf32, #tpu.memory_space<vmem>>, %arg3: memref<2x128x128xf32, #tpu.memory_space<vmem>>, %arg4: memref<1x128xf32, #tpu.memory_space<vmem>>, %arg5: memref<2x128x128xf32, #tpu.memory_space<vmem>>, %arg6: memref<1x128xf32, #tpu.memory_space<vmem>>, %arg7: memref<128x128xf32, #tpu.memory_space<vmem>>, %arg8: memref<1x128xf32, #tpu.memory_space<vmem>>, %arg9: memref<2x128x128xf32, #tpu.memory_space<vmem>>, %arg10: memref<1x128xf32, #tpu.memory_space<vmem>>, %arg11: memref<2x128x128xf32, #tpu.memory_space<vmem>>, %arg12: memref<1x128xf32, #tpu.memory_space<vmem>>, %arg13: memref<2x128x128xf32, #tpu.memory_space<vmem>>, %arg14: memref<1x128xf32, #tpu.memory_space<vmem>>, %arg15: memref<2x128x128xf32, #tpu.memory_space<vmem>>, %arg16: memref<1x128xf32, #tpu.memory_space<vmem>>, %arg17: memref<128x128xf32, #tpu.memory_space<vmem>>, %arg18: memref<1x128xf32, #tpu.memory_space<vmem>>, %arg19: memref<1x16x128xf32, #tpu.memory_space<vmem>>, %arg20: memref<1x128xf32, #tpu.memory_space<vmem>>, %arg21: memref<1x128xf32, #tpu.memory_space<vmem>>, %arg22: memref<2x128xf32, #tpu.memory_space<vmem>>, %arg23: memref<2x128xf32, #tpu.memory_space<vmem>>, %arg24: memref<4x128xf32, #tpu.memory_space<vmem>>, %arg25: memref<4x128xf32, #tpu.memory_space<vmem>>) attributes {dimension_semantics = [#tpu.dimension_semantics<parallel>, #tpu.dimension_semantics<arbitrary>], iteration_bounds = array<i64: 2, 1>, scalar_prefetch = 0 : i64, scratch_operands = 6 : i64, tpu.core_type = #tpu.core_type<tc>, window_params = [{transform_indices = @transform_0, window_bounds = array<i64: 1, 16, 128>}, {pipeline_mode = #tpu.pipeline_mode<synchronous>, transform_indices = @transform_1, window_bounds = array<i64: 2, 128, 128>}, {pipeline_mode = #tpu.pipeline_mode<synchronous>, transform_indices = @transform_2, window_bounds = array<i64: 1, 128>}, {pipeline_mode = #tpu.pipeline_mode<synchronous>, transform_indices = @transform_3, window_bounds = array<i64: 2, 128, 128>}, {pipeline_mode = #tpu.pipeline_mode<synchronous>, transform_indices = @transform_4, window_bounds = array<i64: 1, 128>}, {pipeline_mode = #tpu.pipeline_mode<synchronous>, transform_indices = @transform_5, window_bounds = array<i64: 128, 128>}, {pipeline_mode = #tpu.pipeline_mode<synchronous>, transform_indices = @transform_6, window_bounds = array<i64: 1, 128>}, {pipeline_mode = #tpu.pipeline_mode<synchronous>, transform_indices = @transform_7, window_bounds = array<i64: 2, 128, 128>}, {pipeline_mode = #tpu.pipeline_mode<synchronous>, transform_indices = @transform_8, window_bounds = array<i64: 1, 128>}, {pipeline_mode = #tpu.pipeline_mode<synchronous>, transform_indices = @transform_9, window_bounds = array<i64: 2, 128, 128>}, {pipeline_mode = #tpu.pipeline_mode<synchronous>, transform_indices = @transform_10, window_bounds = array<i64: 1, 128>}, {pipeline_mode = #tpu.pipeline_mode<synchronous>, transform_indices = @transform_11, window_bounds = array<i64: 2, 128, 128>}, {pipeline_mode = #tpu.pipeline_mode<synchronous>, transform_indices = @transform_12, window_bounds = array<i64: 1, 128>}, {pipeline_mode = #tpu.pipeline_mode<synchronous>, transform_indices = @transform_13, window_bounds = array<i64: 2, 128, 128>}, {pipeline_mode = #tpu.pipeline_mode<synchronous>, transform_indices = @transform_14, window_bounds = array<i64: 1, 128>}, {pipeline_mode = #tpu.pipeline_mode<synchronous>, transform_indices = @transform_15, window_bounds = array<i64: 128, 128>}, {pipeline_mode = #tpu.pipeline_mode<synchronous>, transform_indices = @transform_16, window_bounds = array<i64: 1, 128>}, {transform_indices = @transform_17, window_bounds = array<i64: 1, 16, 128>}]} {
    %c0 = arith.constant 0 : index
    %c0_0 = arith.constant 0 : index
    %c0_1 = arith.constant 0 : index
    %0 = vector.load %arg2[%c0, %c0_0, %c0_1] : memref<1x16x128xf32, #tpu.memory_space<vmem>>, vector<1x16x128xf32>
    %1 = vector.shape_cast %0 : vector<1x16x128xf32> to vector<16x128xf32>
    %c0_i32 = arith.constant 0 : i32
    %2 = arith.cmpi eq, %arg1, %c0_i32 : i32
    %3 = arith.extui %2 : i1 to i32
    %c0_i32_2 = arith.constant 0 : i32
    %4 = arith.cmpi ne, %3, %c0_i32_2 : i32
    scf.if %4 {
      %cst_111 = arith.constant 0.000000e+00 : f32
      %135 = vector.broadcast %cst_111 : f32 to vector<1x128xf32>
      %c0_112 = arith.constant 0 : index
      %c0_113 = arith.constant 0 : index
      %136 = vector.load %arg20[%c0_112, %c0_113] : memref<1x128xf32, #tpu.memory_space<vmem>>, vector<1x128xf32>
      tpu.vector_store %arg20[%c0_112, %c0_113], %135 {strides = array<i32>} : memref<1x128xf32, #tpu.memory_space<vmem>>, vector<1x128xf32>,
      %cst_114 = arith.constant 0.000000e+00 : f32
      %137 = vector.broadcast %cst_114 : f32 to vector<1x128xf32>
      %c0_115 = arith.constant 0 : index
      %c0_116 = arith.constant 0 : index
      %138 = vector.load %arg21[%c0_115, %c0_116] : memref<1x128xf32, #tpu.memory_space<vmem>>, vector<1x128xf32>
      tpu.vector_store %arg21[%c0_115, %c0_116], %137 {strides = array<i32>} : memref<1x128xf32, #tpu.memory_space<vmem>>, vector<1x128xf32>,
    } else {
    }
    %c1 = arith.constant 1 : index
    %c0_3 = arith.constant 0 : index
    %c0_4 = arith.constant 0 : index
    %5 = vector.load %arg3[%c1, %c0_3, %c0_4] : memref<2x128x128xf32, #tpu.memory_space<vmem>>, vector<1x128x128xf32>
    %6 = vector.shape_cast %5 : vector<1x128x128xf32> to vector<128x128xf32>
    %cst = arith.constant dense<0.000000e+00> : vector<16x128xf32>
    %7 = tpu.matmul %1, %6, %cst {dimension_numbers = #tpu.dot_dimension_numbers<[1], [0], [0], [1], [0, 0, 1, 1], [], []>} : vector<16x128xf32>, vector<128x128xf32>, vector<16x128xf32> -> vector<16x128xf32>
    %c0_5 = arith.constant 0 : index
    %c0_6 = arith.constant 0 : index
    %8 = vector.load %arg20[%c0_5, %c0_6] : memref<1x128xf32, #tpu.memory_space<vmem>>, vector<1x128xf32>
    %9 = vector.extract_strided_slice %1 {offsets = [0, 0], sizes = [15, 128], strides = [1, 1]} : vector<16x128xf32> to vector<15x128xf32>
    %10 = tpu.concatenate %8, %9 in 0 : vector<1x128xf32>, vector<15x128xf32> -> vector<16x128xf32>
    %c0_7 = arith.constant 0 : index
    %c0_8 = arith.constant 0 : index
    %c0_9 = arith.constant 0 : index
    %11 = vector.load %arg3[%c0_7, %c0_8, %c0_9] : memref<2x128x128xf32, #tpu.memory_space<vmem>>, vector<1x128x128xf32>
    %12 = vector.shape_cast %11 : vector<1x128x128xf32> to vector<128x128xf32>
    %cst_10 = arith.constant dense<0.000000e+00> : vector<16x128xf32>
    %13 = tpu.matmul %10, %12, %cst_10 {dimension_numbers = #tpu.dot_dimension_numbers<[1], [0], [0], [1], [0, 0, 1, 1], [], []>} : vector<16x128xf32>, vector<128x128xf32>, vector<16x128xf32> -> vector<16x128xf32>
    %14 = arith.addf %7, %13 : vector<16x128xf32>
    %c0_11 = arith.constant 0 : index
    %c0_12 = arith.constant 0 : index
    %15 = vector.load %arg4[%c0_11, %c0_12] : memref<1x128xf32, #tpu.memory_space<vmem>>, vector<1x128xf32>
    %16 = vector.broadcast %15 : vector<1x128xf32> to vector<16x128xf32>
    %17 = arith.addf %14, %16 : vector<16x128xf32>
    %cst_13 = arith.constant 0.000000e+00 : f32
    %18 = vector.broadcast %cst_13 : f32 to vector<16x128xf32>
    %19 = arith.maximumf %17, %18 : vector<16x128xf32>
    %c1_14 = arith.constant 1 : index
    %c0_15 = arith.constant 0 : index
    %c0_16 = arith.constant 0 : index
    %20 = vector.load %arg5[%c1_14, %c0_15, %c0_16] : memref<2x128x128xf32, #tpu.memory_space<vmem>>, vector<1x128x128xf32>
    %21 = vector.shape_cast %20 : vector<1x128x128xf32> to vector<128x128xf32>
    %cst_17 = arith.constant dense<0.000000e+00> : vector<16x128xf32>
    %22 = tpu.matmul %19, %21, %cst_17 {dimension_numbers = #tpu.dot_dimension_numbers<[1], [0], [0], [1], [0, 0, 1, 1], [], []>} : vector<16x128xf32>, vector<128x128xf32>, vector<16x128xf32> -> vector<16x128xf32>
    %c0_18 = arith.constant 0 : index
    %c0_19 = arith.constant 0 : index
    %23 = vector.load %arg21[%c0_18, %c0_19] : memref<1x128xf32, #tpu.memory_space<vmem>>, vector<1x128xf32>
    %24 = vector.extract_strided_slice %19 {offsets = [0, 0], sizes = [15, 128], strides = [1, 1]} : vector<16x128xf32> to vector<15x128xf32>
    %25 = tpu.concatenate %23, %24 in 0 : vector<1x128xf32>, vector<15x128xf32> -> vector<16x128xf32>
    %c0_20 = arith.constant 0 : index
    %c0_21 = arith.constant 0 : index
    %c0_22 = arith.constant 0 : index
    %26 = vector.load %arg5[%c0_20, %c0_21, %c0_22] : memref<2x128x128xf32, #tpu.memory_space<vmem>>, vector<1x128x128xf32>
    %27 = vector.shape_cast %26 : vector<1x128x128xf32> to vector<128x128xf32>
    %cst_23 = arith.constant dense<0.000000e+00> : vector<16x128xf32>
    %28 = tpu.matmul %25, %27, %cst_23 {dimension_numbers = #tpu.dot_dimension_numbers<[1], [0], [0], [1], [0, 0, 1, 1], [], []>} : vector<16x128xf32>, vector<128x128xf32>, vector<16x128xf32> -> vector<16x128xf32>
    %29 = arith.addf %22, %28 : vector<16x128xf32>
    %c0_24 = arith.constant 0 : index
    %c0_25 = arith.constant 0 : index
    %30 = vector.load %arg6[%c0_24, %c0_25] : memref<1x128xf32, #tpu.memory_space<vmem>>, vector<1x128xf32>
    %31 = vector.broadcast %30 : vector<1x128xf32> to vector<16x128xf32>
    %32 = arith.addf %29, %31 : vector<16x128xf32>
    %cst_26 = arith.constant 0.000000e+00 : f32
    %33 = vector.broadcast %cst_26 : f32 to vector<16x128xf32>
    %34 = arith.maximumf %32, %33 : vector<16x128xf32>
    %c0_27 = arith.constant 0 : index
    %c0_28 = arith.constant 0 : index
    %35 = vector.load %arg7[%c0_27, %c0_28] : memref<128x128xf32, #tpu.memory_space<vmem>>, vector<128x128xf32>
    %cst_29 = arith.constant dense<0.000000e+00> : vector<16x128xf32>
    %36 = tpu.matmul %1, %35, %cst_29 {dimension_numbers = #tpu.dot_dimension_numbers<[1], [0], [0], [1], [0, 0, 1, 1], [], []>} : vector<16x128xf32>, vector<128x128xf32>, vector<16x128xf32> -> vector<16x128xf32>
    %c0_30 = arith.constant 0 : index
    %c0_31 = arith.constant 0 : index
    %37 = vector.load %arg8[%c0_30, %c0_31] : memref<1x128xf32, #tpu.memory_space<vmem>>, vector<1x128xf32>
    %38 = vector.broadcast %37 : vector<1x128xf32> to vector<16x128xf32>
    %39 = arith.addf %36, %38 : vector<16x128xf32>
    %40 = vector.extract_strided_slice %1 {offsets = [15, 0], sizes = [1, 128], strides = [1, 1]} : vector<16x128xf32> to vector<1x128xf32>
    %c0_32 = arith.constant 0 : index
    %c0_33 = arith.constant 0 : index
    %41 = vector.load %arg20[%c0_32, %c0_33] : memref<1x128xf32, #tpu.memory_space<vmem>>, vector<1x128xf32>
    tpu.vector_store %arg20[%c0_32, %c0_33], %40 {strides = array<i32>} : memref<1x128xf32, #tpu.memory_space<vmem>>, vector<1x128xf32>,
    %42 = vector.extract_strided_slice %19 {offsets = [15, 0], sizes = [1, 128], strides = [1, 1]} : vector<16x128xf32> to vector<1x128xf32>
    %c0_34 = arith.constant 0 : index
    %c0_35 = arith.constant 0 : index
    %43 = vector.load %arg21[%c0_34, %c0_35] : memref<1x128xf32, #tpu.memory_space<vmem>>, vector<1x128xf32>
    tpu.vector_store %arg21[%c0_34, %c0_35], %42 {strides = array<i32>} : memref<1x128xf32, #tpu.memory_space<vmem>>, vector<1x128xf32>,
    %44 = arith.addf %34, %39 : vector<16x128xf32>
    %cst_36 = arith.constant 0.000000e+00 : f32
    %45 = vector.broadcast %cst_36 : f32 to vector<16x128xf32>
    %46 = arith.maximumf %44, %45 : vector<16x128xf32>
    %c0_i32_37 = arith.constant 0 : i32
    %47 = arith.cmpi eq, %arg1, %c0_i32_37 : i32
    %48 = arith.extui %47 : i1 to i32
    %c0_i32_38 = arith.constant 0 : i32
    %49 = arith.cmpi ne, %48, %c0_i32_38 : i32
    scf.if %49 {
      %cst_111 = arith.constant 0.000000e+00 : f32
      %135 = vector.broadcast %cst_111 : f32 to vector<2x128xf32>
      %c0_112 = arith.constant 0 : index
      %c0_113 = arith.constant 0 : index
      %136 = vector.load %arg22[%c0_112, %c0_113] : memref<2x128xf32, #tpu.memory_space<vmem>>, vector<2x128xf32>
      tpu.vector_store %arg22[%c0_112, %c0_113], %135 {strides = array<i32>} : memref<2x128xf32, #tpu.memory_space<vmem>>, vector<2x128xf32>,
      %cst_114 = arith.constant 0.000000e+00 : f32
      %137 = vector.broadcast %cst_114 : f32 to vector<2x128xf32>
      %c0_115 = arith.constant 0 : index
      %c0_116 = arith.constant 0 : index
      %138 = vector.load %arg23[%c0_115, %c0_116] : memref<2x128xf32, #tpu.memory_space<vmem>>, vector<2x128xf32>
      tpu.vector_store %arg23[%c0_115, %c0_116], %137 {strides = array<i32>} : memref<2x128xf32, #tpu.memory_space<vmem>>, vector<2x128xf32>,
    } else {
    }
    %c1_39 = arith.constant 1 : index
    %c0_40 = arith.constant 0 : index
    %c0_41 = arith.constant 0 : index
    %50 = vector.load %arg9[%c1_39, %c0_40, %c0_41] : memref<2x128x128xf32, #tpu.memory_space<vmem>>, vector<1x128x128xf32>
    %51 = vector.shape_cast %50 : vector<1x128x128xf32> to vector<128x128xf32>
    %cst_42 = arith.constant dense<0.000000e+00> : vector<16x128xf32>
    %52 = tpu.matmul %46, %51, %cst_42 {dimension_numbers = #tpu.dot_dimension_numbers<[1], [0], [0], [1], [0, 0, 1, 1], [], []>} : vector<16x128xf32>, vector<128x128xf32>, vector<16x128xf32> -> vector<16x128xf32>
    %c0_43 = arith.constant 0 : index
    %c0_44 = arith.constant 0 : index
    %53 = vector.load %arg22[%c0_43, %c0_44] : memref<2x128xf32, #tpu.memory_space<vmem>>, vector<2x128xf32>
    %54 = vector.extract_strided_slice %46 {offsets = [0, 0], sizes = [14, 128], strides = [1, 1]} : vector<16x128xf32> to vector<14x128xf32>
    %55 = tpu.concatenate %53, %54 in 0 : vector<2x128xf32>, vector<14x128xf32> -> vector<16x128xf32>
    %c0_45 = arith.constant 0 : index
    %c0_46 = arith.constant 0 : index
    %c0_47 = arith.constant 0 : index
    %56 = vector.load %arg9[%c0_45, %c0_46, %c0_47] : memref<2x128x128xf32, #tpu.memory_space<vmem>>, vector<1x128x128xf32>
    %57 = vector.shape_cast %56 : vector<1x128x128xf32> to vector<128x128xf32>
    %cst_48 = arith.constant dense<0.000000e+00> : vector<16x128xf32>
    %58 = tpu.matmul %55, %57, %cst_48 {dimension_numbers = #tpu.dot_dimension_numbers<[1], [0], [0], [1], [0, 0, 1, 1], [], []>} : vector<16x128xf32>, vector<128x128xf32>, vector<16x128xf32> -> vector<16x128xf32>
    %59 = arith.addf %52, %58 : vector<16x128xf32>
    %c0_49 = arith.constant 0 : index
    %c0_50 = arith.constant 0 : index
    %60 = vector.load %arg10[%c0_49, %c0_50] : memref<1x128xf32, #tpu.memory_space<vmem>>, vector<1x128xf32>
    %61 = vector.broadcast %60 : vector<1x128xf32> to vector<16x128xf32>
    %62 = arith.addf %59, %61 : vector<16x128xf32>
    %cst_51 = arith.constant 0.000000e+00 : f32
    %63 = vector.broadcast %cst_51 : f32 to vector<16x128xf32>
    %64 = arith.maximumf %62, %63 : vector<16x128xf32>
    %c1_52 = arith.constant 1 : index
    %c0_53 = arith.constant 0 : index
    %c0_54 = arith.constant 0 : index
    %65 = vector.load %arg11[%c1_52, %c0_53, %c0_54] : memref<2x128x128xf32, #tpu.memory_space<vmem>>, vector<1x128x128xf32>
    %66 = vector.shape_cast %65 : vector<1x128x128xf32> to vector<128x128xf32>
    %cst_55 = arith.constant dense<0.000000e+00> : vector<16x128xf32>
    %67 = tpu.matmul %64, %66, %cst_55 {dimension_numbers = #tpu.dot_dimension_numbers<[1], [0], [0], [1], [0, 0, 1, 1], [], []>} : vector<16x128xf32>, vector<128x128xf32>, vector<16x128xf32> -> vector<16x128xf32>
    %c0_56 = arith.constant 0 : index
    %c0_57 = arith.constant 0 : index
    %68 = vector.load %arg23[%c0_56, %c0_57] : memref<2x128xf32, #tpu.memory_space<vmem>>, vector<2x128xf32>
    %69 = vector.extract_strided_slice %64 {offsets = [0, 0], sizes = [14, 128], strides = [1, 1]} : vector<16x128xf32> to vector<14x128xf32>
    %70 = tpu.concatenate %68, %69 in 0 : vector<2x128xf32>, vector<14x128xf32> -> vector<16x128xf32>
    %c0_58 = arith.constant 0 : index
    %c0_59 = arith.constant 0 : index
    %c0_60 = arith.constant 0 : index
    %71 = vector.load %arg11[%c0_58, %c0_59, %c0_60] : memref<2x128x128xf32, #tpu.memory_space<vmem>>, vector<1x128x128xf32>
    %72 = vector.shape_cast %71 : vector<1x128x128xf32> to vector<128x128xf32>
    %cst_61 = arith.constant dense<0.000000e+00> : vector<16x128xf32>
    %73 = tpu.matmul %70, %72, %cst_61 {dimension_numbers = #tpu.dot_dimension_numbers<[1], [0], [0], [1], [0, 0, 1, 1], [], []>} : vector<16x128xf32>, vector<128x128xf32>, vector<16x128xf32> -> vector<16x128xf32>
    %74 = arith.addf %67, %73 : vector<16x128xf32>
    %c0_62 = arith.constant 0 : index
    %c0_63 = arith.constant 0 : index
    %75 = vector.load %arg12[%c0_62, %c0_63] : memref<1x128xf32, #tpu.memory_space<vmem>>, vector<1x128xf32>
    %76 = vector.broadcast %75 : vector<1x128xf32> to vector<16x128xf32>
    %77 = arith.addf %74, %76 : vector<16x128xf32>
    %cst_64 = arith.constant 0.000000e+00 : f32
    %78 = vector.broadcast %cst_64 : f32 to vector<16x128xf32>
    %79 = arith.maximumf %77, %78 : vector<16x128xf32>
    %80 = vector.extract_strided_slice %46 {offsets = [14, 0], sizes = [2, 128], strides = [1, 1]} : vector<16x128xf32> to vector<2x128xf32>
    %c0_65 = arith.constant 0 : index
    %c0_66 = arith.constant 0 : index
    %81 = vector.load %arg22[%c0_65, %c0_66] : memref<2x128xf32, #tpu.memory_space<vmem>>, vector<2x128xf32>
    tpu.vector_store %arg22[%c0_65, %c0_66], %80 {strides = array<i32>} : memref<2x128xf32, #tpu.memory_space<vmem>>, vector<2x128xf32>,
    %82 = vector.extract_strided_slice %64 {offsets = [14, 0], sizes = [2, 128], strides = [1, 1]} : vector<16x128xf32> to vector<2x128xf32>
    %c0_67 = arith.constant 0 : index
    %c0_68 = arith.constant 0 : index
    %83 = vector.load %arg23[%c0_67, %c0_68] : memref<2x128xf32, #tpu.memory_space<vmem>>, vector<2x128xf32>
    tpu.vector_store %arg23[%c0_67, %c0_68], %82 {strides = array<i32>} : memref<2x128xf32, #tpu.memory_space<vmem>>, vector<2x128xf32>,
    %84 = arith.addf %79, %46 : vector<16x128xf32>
    %cst_69 = arith.constant 0.000000e+00 : f32
    %85 = vector.broadcast %cst_69 : f32 to vector<16x128xf32>
    %86 = arith.maximumf %84, %85 : vector<16x128xf32>
    %c0_i32_70 = arith.constant 0 : i32
    %87 = arith.cmpi eq, %arg1, %c0_i32_70 : i32
    %88 = arith.extui %87 : i1 to i32
    %c0_i32_71 = arith.constant 0 : i32
    %89 = arith.cmpi ne, %88, %c0_i32_71 : i32
    scf.if %89 {
      %cst_111 = arith.constant 0.000000e+00 : f32
      %135 = vector.broadcast %cst_111 : f32 to vector<4x128xf32>
      %c0_112 = arith.constant 0 : index
      %c0_113 = arith.constant 0 : index
      %136 = vector.load %arg24[%c0_112, %c0_113] : memref<4x128xf32, #tpu.memory_space<vmem>>, vector<4x128xf32>
      tpu.vector_store %arg24[%c0_112, %c0_113], %135 {strides = array<i32>} : memref<4x128xf32, #tpu.memory_space<vmem>>, vector<4x128xf32>,
      %cst_114 = arith.constant 0.000000e+00 : f32
      %137 = vector.broadcast %cst_114 : f32 to vector<4x128xf32>
      %c0_115 = arith.constant 0 : index
      %c0_116 = arith.constant 0 : index
      %138 = vector.load %arg25[%c0_115, %c0_116] : memref<4x128xf32, #tpu.memory_space<vmem>>, vector<4x128xf32>
      tpu.vector_store %arg25[%c0_115, %c0_116], %137 {strides = array<i32>} : memref<4x128xf32, #tpu.memory_space<vmem>>, vector<4x128xf32>,
    } else {
    }
    %c1_72 = arith.constant 1 : index
    %c0_73 = arith.constant 0 : index
    %c0_74 = arith.constant 0 : index
    %90 = vector.load %arg13[%c1_72, %c0_73, %c0_74] : memref<2x128x128xf32, #tpu.memory_space<vmem>>, vector<1x128x128xf32>
    %91 = vector.shape_cast %90 : vector<1x128x128xf32> to vector<128x128xf32>
    %cst_75 = arith.constant dense<0.000000e+00> : vector<16x128xf32>
    %92 = tpu.matmul %86, %91, %cst_75 {dimension_numbers = #tpu.dot_dimension_numbers<[1], [0], [0], [1], [0, 0, 1, 1], [], []>} : vector<16x128xf32>, vector<128x128xf32>, vector<16x128xf32> -> vector<16x128xf32>
    %c0_76 = arith.constant 0 : index
    %c0_77 = arith.constant 0 : index
    %93 = vector.load %arg24[%c0_76, %c0_77] : memref<4x128xf32, #tpu.memory_space<vmem>>, vector<4x128xf32>
    %94 = vector.extract_strided_slice %86 {offsets = [0, 0], sizes = [12, 128], strides = [1, 1]} : vector<16x128xf32> to vector<12x128xf32>
    %95 = tpu.concatenate %93, %94 in 0 : vector<4x128xf32>, vector<12x128xf32> -> vector<16x128xf32>
    %c0_78 = arith.constant 0 : index
    %c0_79 = arith.constant 0 : index
    %c0_80 = arith.constant 0 : index
    %96 = vector.load %arg13[%c0_78, %c0_79, %c0_80] : memref<2x128x128xf32, #tpu.memory_space<vmem>>, vector<1x128x128xf32>
    %97 = vector.shape_cast %96 : vector<1x128x128xf32> to vector<128x128xf32>
    %cst_81 = arith.constant dense<0.000000e+00> : vector<16x128xf32>
    %98 = tpu.matmul %95, %97, %cst_81 {dimension_numbers = #tpu.dot_dimension_numbers<[1], [0], [0], [1], [0, 0, 1, 1], [], []>} : vector<16x128xf32>, vector<128x128xf32>, vector<16x128xf32> -> vector<16x128xf32>
    %99 = arith.addf %92, %98 : vector<16x128xf32>
    %c0_82 = arith.constant 0 : index
    %c0_83 = arith.constant 0 : index
    %100 = vector.load %arg14[%c0_82, %c0_83] : memref<1x128xf32, #tpu.memory_space<vmem>>, vector<1x128xf32>
    %101 = vector.broadcast %100 : vector<1x128xf32> to vector<16x128xf32>
    %102 = arith.addf %99, %101 : vector<16x128xf32>
    %cst_84 = arith.constant 0.000000e+00 : f32
    %103 = vector.broadcast %cst_84 : f32 to vector<16x128xf32>
    %104 = arith.maximumf %102, %103 : vector<16x128xf32>
    %c1_85 = arith.constant 1 : index
    %c0_86 = arith.constant 0 : index
    %c0_87 = arith.constant 0 : index
    %105 = vector.load %arg15[%c1_85, %c0_86, %c0_87] : memref<2x128x128xf32, #tpu.memory_space<vmem>>, vector<1x128x128xf32>
    %106 = vector.shape_cast %105 : vector<1x128x128xf32> to vector<128x128xf32>
    %cst_88 = arith.constant dense<0.000000e+00> : vector<16x128xf32>
    %107 = tpu.matmul %104, %106, %cst_88 {dimension_numbers = #tpu.dot_dimension_numbers<[1], [0], [0], [1], [0, 0, 1, 1], [], []>} : vector<16x128xf32>, vector<128x128xf32>, vector<16x128xf32> -> vector<16x128xf32>
    %c0_89 = arith.constant 0 : index
    %c0_90 = arith.constant 0 : index
    %108 = vector.load %arg25[%c0_89, %c0_90] : memref<4x128xf32, #tpu.memory_space<vmem>>, vector<4x128xf32>
    %109 = vector.extract_strided_slice %104 {offsets = [0, 0], sizes = [12, 128], strides = [1, 1]} : vector<16x128xf32> to vector<12x128xf32>
    %110 = tpu.concatenate %108, %109 in 0 : vector<4x128xf32>, vector<12x128xf32> -> vector<16x128xf32>
    %c0_91 = arith.constant 0 : index
    %c0_92 = arith.constant 0 : index
    %c0_93 = arith.constant 0 : index
    %111 = vector.load %arg15[%c0_91, %c0_92, %c0_93] : memref<2x128x128xf32, #tpu.memory_space<vmem>>, vector<1x128x128xf32>
    %112 = vector.shape_cast %111 : vector<1x128x128xf32> to vector<128x128xf32>
    %cst_94 = arith.constant dense<0.000000e+00> : vector<16x128xf32>
    %113 = tpu.matmul %110, %112, %cst_94 {dimension_numbers = #tpu.dot_dimension_numbers<[1], [0], [0], [1], [0, 0, 1, 1], [], []>} : vector<16x128xf32>, vector<128x128xf32>, vector<16x128xf32> -> vector<16x128xf32>
    %114 = arith.addf %107, %113 : vector<16x128xf32>
    %c0_95 = arith.constant 0 : index
    %c0_96 = arith.constant 0 : index
    %115 = vector.load %arg16[%c0_95, %c0_96] : memref<1x128xf32, #tpu.memory_space<vmem>>, vector<1x128xf32>
    %116 = vector.broadcast %115 : vector<1x128xf32> to vector<16x128xf32>
    %117 = arith.addf %114, %116 : vector<16x128xf32>
    %cst_97 = arith.constant 0.000000e+00 : f32
    %118 = vector.broadcast %cst_97 : f32 to vector<16x128xf32>
    %119 = arith.maximumf %117, %118 : vector<16x128xf32>
    %c0_98 = arith.constant 0 : index
    %c0_99 = arith.constant 0 : index
    %120 = vector.load %arg17[%c0_98, %c0_99] : memref<128x128xf32, #tpu.memory_space<vmem>>, vector<128x128xf32>
    %cst_100 = arith.constant dense<0.000000e+00> : vector<16x128xf32>
    %121 = tpu.matmul %86, %120, %cst_100 {dimension_numbers = #tpu.dot_dimension_numbers<[1], [0], [0], [1], [0, 0, 1, 1], [], []>} : vector<16x128xf32>, vector<128x128xf32>, vector<16x128xf32> -> vector<16x128xf32>
    %c0_101 = arith.constant 0 : index
    %c0_102 = arith.constant 0 : index
    %122 = vector.load %arg18[%c0_101, %c0_102] : memref<1x128xf32, #tpu.memory_space<vmem>>, vector<1x128xf32>
    %123 = vector.broadcast %122 : vector<1x128xf32> to vector<16x128xf32>
    %124 = arith.addf %121, %123 : vector<16x128xf32>
    %125 = vector.extract_strided_slice %86 {offsets = [12, 0], sizes = [4, 128], strides = [1, 1]} : vector<16x128xf32> to vector<4x128xf32>
    %c0_103 = arith.constant 0 : index
    %c0_104 = arith.constant 0 : index
    %126 = vector.load %arg24[%c0_103, %c0_104] : memref<4x128xf32, #tpu.memory_space<vmem>>, vector<4x128xf32>
    tpu.vector_store %arg24[%c0_103, %c0_104], %125 {strides = array<i32>} : memref<4x128xf32, #tpu.memory_space<vmem>>, vector<4x128xf32>,
    %127 = vector.extract_strided_slice %104 {offsets = [12, 0], sizes = [4, 128], strides = [1, 1]} : vector<16x128xf32> to vector<4x128xf32>
    %c0_105 = arith.constant 0 : index
    %c0_106 = arith.constant 0 : index
    %128 = vector.load %arg25[%c0_105, %c0_106] : memref<4x128xf32, #tpu.memory_space<vmem>>, vector<4x128xf32>
    tpu.vector_store %arg25[%c0_105, %c0_106], %127 {strides = array<i32>} : memref<4x128xf32, #tpu.memory_space<vmem>>, vector<4x128xf32>,
    %129 = arith.addf %119, %124 : vector<16x128xf32>
    %cst_107 = arith.constant 0.000000e+00 : f32
    %130 = vector.broadcast %cst_107 : f32 to vector<16x128xf32>
    %131 = arith.maximumf %129, %130 : vector<16x128xf32>
    %c0_108 = arith.constant 0 : index
    %c0_109 = arith.constant 0 : index
    %c0_110 = arith.constant 0 : index
    %132 = vector.load %arg19[%c0_108, %c0_109, %c0_110] : memref<1x16x128xf32, #tpu.memory_space<vmem>>, vector<1x16x128xf32>
    %133 = vector.shape_cast %132 : vector<1x16x128xf32> to vector<16x128xf32>
    %134 = vector.shape_cast %131 : vector<16x128xf32> to vector<1x16x128xf32>
    tpu.vector_store %arg19[%c0_108, %c0_109, %c0_110], %134 {strides = array<i32>} : memref<1x16x128xf32, #tpu.memory_space<vmem>>, vector<1x16x128xf32>,
    return
  }
  func.func @transform_0(%arg0: i32, %arg1: i32) -> (i32, i32, i32) {
    %c0_i32 = arith.constant 0 : i32
    %c0_i32_0 = arith.constant 0 : i32
    return %arg0, %arg1, %c0_i32 : i32, i32, i32
  }
  func.func @transform_1(%arg0: i32, %arg1: i32) -> (i32, i32, i32) {
    %c0_i32 = arith.constant 0 : i32
    %c0_i32_0 = arith.constant 0 : i32
    %c0_i32_1 = arith.constant 0 : i32
    %c0_i32_2 = arith.constant 0 : i32
    return %c0_i32, %c0_i32_0, %c0_i32_1 : i32, i32, i32
  }
  func.func @transform_2(%arg0: i32, %arg1: i32) -> (i32, i32) {
    %c0_i32 = arith.constant 0 : i32
    %c0_i32_0 = arith.constant 0 : i32
    %c0_i32_1 = arith.constant 0 : i32
    return %c0_i32, %c0_i32_0 : i32, i32
  }
  func.func @transform_3(%arg0: i32, %arg1: i32) -> (i32, i32, i32) {
    %c0_i32 = arith.constant 0 : i32
    %c0_i32_0 = arith.constant 0 : i32
    %c0_i32_1 = arith.constant 0 : i32
    %c0_i32_2 = arith.constant 0 : i32
    return %c0_i32, %c0_i32_0, %c0_i32_1 : i32, i32, i32
  }
  func.func @transform_4(%arg0: i32, %arg1: i32) -> (i32, i32) {
    %c0_i32 = arith.constant 0 : i32
    %c0_i32_0 = arith.constant 0 : i32
    %c0_i32_1 = arith.constant 0 : i32
    return %c0_i32, %c0_i32_0 : i32, i32
  }
  func.func @transform_5(%arg0: i32, %arg1: i32) -> (i32, i32) {
    %c0_i32 = arith.constant 0 : i32
    %c0_i32_0 = arith.constant 0 : i32
    %c0_i32_1 = arith.constant 0 : i32
    return %c0_i32, %c0_i32_0 : i32, i32
  }
  func.func @transform_6(%arg0: i32, %arg1: i32) -> (i32, i32) {
    %c0_i32 = arith.constant 0 : i32
    %c0_i32_0 = arith.constant 0 : i32
    %c0_i32_1 = arith.constant 0 : i32
    return %c0_i32, %c0_i32_0 : i32, i32
  }
  func.func @transform_7(%arg0: i32, %arg1: i32) -> (i32, i32, i32) {
    %c0_i32 = arith.constant 0 : i32
    %c0_i32_0 = arith.constant 0 : i32
    %c0_i32_1 = arith.constant 0 : i32
    %c0_i32_2 = arith.constant 0 : i32
    return %c0_i32, %c0_i32_0, %c0_i32_1 : i32, i32, i32
  }
  func.func @transform_8(%arg0: i32, %arg1: i32) -> (i32, i32) {
    %c0_i32 = arith.constant 0 : i32
    %c0_i32_0 = arith.constant 0 : i32
    %c0_i32_1 = arith.constant 0 : i32
    return %c0_i32, %c0_i32_0 : i32, i32
  }
  func.func @transform_9(%arg0: i32, %arg1: i32) -> (i32, i32, i32) {
    %c0_i32 = arith.constant 0 : i32
    %c0_i32_0 = arith.constant 0 : i32
    %c0_i32_1 = arith.constant 0 : i32
    %c0_i32_2 = arith.constant 0 : i32
    return %c0_i32, %c0_i32_0, %c0_i32_1 : i32, i32, i32
  }
  func.func @transform_10(%arg0: i32, %arg1: i32) -> (i32, i32) {
    %c0_i32 = arith.constant 0 : i32
    %c0_i32_0 = arith.constant 0 : i32
    %c0_i32_1 = arith.constant 0 : i32
    return %c0_i32, %c0_i32_0 : i32, i32
  }
  func.func @transform_11(%arg0: i32, %arg1: i32) -> (i32, i32, i32) {
    %c0_i32 = arith.constant 0 : i32
    %c0_i32_0 = arith.constant 0 : i32
    %c0_i32_1 = arith.constant 0 : i32
    %c0_i32_2 = arith.constant 0 : i32
    return %c0_i32, %c0_i32_0, %c0_i32_1 : i32, i32, i32
  }
  func.func @transform_12(%arg0: i32, %arg1: i32) -> (i32, i32) {
    %c0_i32 = arith.constant 0 : i32
    %c0_i32_0 = arith.constant 0 : i32
    %c0_i32_1 = arith.constant 0 : i32
    return %c0_i32, %c0_i32_0 : i32, i32
  }
  func.func @transform_13(%arg0: i32, %arg1: i32) -> (i32, i32, i32) {
    %c0_i32 = arith.constant 0 : i32
    %c0_i32_0 = arith.constant 0 : i32
    %c0_i32_1 = arith.constant 0 : i32
    %c0_i32_2 = arith.constant 0 : i32
    return %c0_i32, %c0_i32_0, %c0_i32_1 : i32, i32, i32
  }
  func.func @transform_14(%arg0: i32, %arg1: i32) -> (i32, i32) {
    %c0_i32 = arith.constant 0 : i32
    %c0_i32_0 = arith.constant 0 : i32
    %c0_i32_1 = arith.constant 0 : i32
    return %c0_i32, %c0_i32_0 : i32, i32
  }
  func.func @transform_15(%arg0: i32, %arg1: i32) -> (i32, i32) {
    %c0_i32 = arith.constant 0 : i32
    %c0_i32_0 = arith.constant 0 : i32
    %c0_i32_1 = arith.constant 0 : i32
    return %c0_i32, %c0_i32_0 : i32, i32
  }
  func.func @transform_16(%arg0: i32, %arg1: i32) -> (i32, i32) {
    %c0_i32 = arith.constant 0 : i32
    %c0_i32_0 = arith.constant 0 : i32
    %c0_i32_1 = arith.constant 0 : i32
    return %c0_i32, %c0_i32_0 : i32, i32
  }
  func.func @transform_17(%arg0: i32, %arg1: i32) -> (i32, i32, i32) {
    %c0_i32 = arith.constant 0 : i32
    %c0_i32_0 = arith.constant 0 : i32
    return %arg0, %arg1, %c0_i32 : i32, i32, i32
  }
}

</mosaic_0001>

<bundles_post_ra>
// kernel: tpu_custom_call.1
= control target key start
LH: loop header
LB: loop body
LE: loop exit
PB: predicated region body
PF: predicated region fallthrough
CT: control target
= control target key end

     0   :  { %s4670_s0 = inlined_call_operand.hbm [shape: f32[2,16,128], index: 0, kind: input, shape index: {}]   ;;  %s4671_s1 = inlined_call_operand.hbm [shape: f32[2,128,128], index: 1, kind: input, shape index: {}]   ;;  %s4672_s2 = inlined_call_operand.vmem [shape: f32[1,128], index: 2, kind: input, shape index: {}]   ;;  %s4673_s3 = inlined_call_operand.hbm [shape: f32[2,128,128], index: 3, kind: input, shape index: {}]   ;;  %s4674_s4 = inlined_call_operand.vmem [shape: f32[1,128], index: 4, kind: input, shape index: {}]   ;;  %s4675_s5 = inlined_call_operand.hbm [shape: f32[128,128], index: 5, kind: input, shape index: {}]   ;;  %s4676_s6 = inlined_call_operand.vmem [shape: f32[1,128], index: 6, kind: input, shape index: {}]   ;;  %s4677_s7 = inlined_call_operand.hbm [shape: f32[2,128,128], index: 7, kind: input, shape index: {}]   ;;  %s4678_s8 = inlined_call_operand.vmem [shape: f32[1,128], index: 8, kind: input, shape index: {}]   ;;  %s4679_s9 = inlined_call_operand.hbm [shape: f32[2,128,128], index: 9, kind: input, shape index: {}]   ;;  %s4680_s10 = inlined_call_operand.vmem [shape: f32[1,128], index: 10, kind: input, shape index: {}]   ;;  %s4681_s11 = inlined_call_operand.hbm [shape: f32[2,128,128], index: 11, kind: input, shape index: {}]   ;;  %s4682_s12 = inlined_call_operand.vmem [shape: f32[1,128], index: 12, kind: input, shape index: {}]   ;;  %s4683_s13 = inlined_call_operand.hbm [shape: f32[2,128,128], index: 13, kind: input, shape index: {}]   ;;  %s4684_s14 = inlined_call_operand.vmem [shape: f32[1,128], index: 14, kind: input, shape index: {}]   ;;  %s4685_s15 = inlined_call_operand.hbm [shape: f32[128,128], index: 15, kind: input, shape index: {}]   ;;  %s4686_s16 = inlined_call_operand.vmem [shape: f32[1,128], index: 16, kind: input, shape index: {}]   ;;  %s4687_s17 = inlined_call_operand.hbm [shape: f32[2,16,128], index: 17, kind: output, shape index: {}]  }
   0x1   :  { %4698 = sst [smem:[#allocation31_spill]] %s4670_s0 }
   0x2   :  { %4699 = sst [smem:[#allocation32_spill]] %s4671_s1 }
   0x3   :  { %4700 = sst [smem:[#allocation33_spill]] %s4672_s2 }
   0x4   :  { %4701 = sst [smem:[#allocation34_spill]] %s4674_s4 }
   0x5   :  { %4702 = sst [smem:[#allocation35_spill]] %s4675_s5 }
   0x6   :  { %4703 = sst [smem:[#allocation36_spill]] %s4676_s6 }
   0x7   :  { %4704 = sst [smem:[#allocation37_spill]] %s4678_s8 }
   0x8   :  { %4705 = sst [smem:[#allocation38_spill]] %s4680_s10 }
   0x9   :  { %4706 = sst [smem:[#allocation39_spill]] %s4682_s12 }
   0xa   :  { %4707 = sst [smem:[#allocation40_spill]] %s4684_s14 }
   0xb   :  { %4708 = sst [smem:[#allocation41_spill]] %s4686_s16 }
   0xc   :  { %4709 = sst [smem:[#allocation42_spill]] %s4687_s17 }
   0xd   :  { %22 = vsyncpa [#allocation9], 0 }
   0xe   :  { %24 = vsyncpa [#allocation9 + $0x1], 0 }
   0xf   :  { %25 = vsyncpa [#allocation12], 0 }
  0x10   :  { %26 = vsyncpa [#allocation15], 0 }
  0x11   :  { %27 = vsyncpa [#allocation18], 0 }
  0x12   :  { %28 = vsyncpa [#allocation21], 0 }
  0x13   :  { %29 = vsyncpa [#allocation10], 0 }
  0x14   :  { %31 = vsyncpa [#allocation10 + $0x1], 0  ;;  %s4187_s24 = smov 0   ;;  %s4189_s25 = smov 0  }
  0x15   :  { %s4191_s26 = smov 0   ;;  %s4193_s27 = smov 0  }
  0x16   :  { %s4195_s28 = smov 0   ;;  %s4197_s29 = smov 0  }
  0x17 LB: > { %4710 = sst [smem:[#allocation30_spill]] %s4072_s27  ;;  %s4690_s0 = sadd.s32 4294967295, %s4080_s29   ;;  %s4080_s29 = sphi %s4197_s29, %s37_s29   ;;  %s4076_s28 = sphi %s4195_s28, %s4746_s28   ;;  %s4072_s27 = sphi %s4193_s27, %s4745_s27   ;;  %s4068_s26 = sphi %s4191_s26, %s4744_s26   ;;  %s4064_s25 = sphi %s4189_s25, %s4743_s25   ;;  %s4060_s24 = sphi %s4187_s24, %s4742_s24  }
  0x18   : > { %p2339_p0 = scmp.ge.s32.totalorder %s4080_s29, 1  ;;  %p4221_p1 = scmp.eq.s32.totalorder %s4690_s0, 0 }
  0x19   : > { %p446_p2 = scmp.lt.s32.totalorder %s4080_s29, 3  ;;  %s4082_s19 = smov [#allocation11]  }
  0x1a   : > { %s4711_s30 = scalar_select %p4221_p1, 1, 0 }
  0x1b   : > { %p4226_p3 = pnand %p2339_p0, %p446_p2  ;;  %s458_s1 = sshll.u32 %s4082_s19, 4  ;;  %s4230_s1 = int_to_ptr.vmem [resolvable:$true] %s458_s1 }
  0x1c   : > { %s4083_s21 = smov [#allocation14]   ;;  %s4084_s23 = smov [#allocation17]  }
  0x1d   : > { %s4712_s18 = scalar_select %p4226_p3, 1, 0 }
  0x1e   : > { %p3616_p4 = pneg %p4226_p3  ;;  %s490_s22 = sshll.u32 %s4083_s21, 4  ;;  %s4241_s22 = int_to_ptr.vmem [resolvable:$true] %s490_s22 }
  0x1f   : > { %s4243_s0 = sshll.u32 %s4084_s23, 4  ;;  %s4714_s16 = sld [smem:[#allocation32_spill]]  ;;  %s523_s0 = int_to_ptr.vmem [resolvable:$true] %s4243_s0 }
  0x20   : > { %p4237_p6 = pnand %p3616_p4, %p4221_p1 }
  0x22   : > { %p4253_p8 = pneg %p4237_p6 }
  0x25   : > { %s3728_s14 = scalar_lea.hbm %s4714_s16, 4096 }
  0x26   : > { %p3729_p7 = scmp.ne.s32.totalorder %s4714_s16, %s3728_s14  ;;  %p3735_p11 = scmp.lt.u32.totalorder %s3728_s14, %s4714_s16 }
  0x28   : > { %p3731_p9 = pnand %p4253_p8, %p3729_p7 }
  0x2a   : > { %p3732_p10 = pneg %p3731_p9 }
  0x2c   : > { %p3737_p12 = pnand %p3735_p11, %p3732_p10 }
  0x2e   : > { %3740 = shalt.err (!%p3737_p12)
}
  0x2f   : > { %s3741_s12 = scalar_lea.vmem %s4230_s1, 4096  ;;  %p3749_p4 = scmp.lt.s32.totalorder %s4230_s1, %s4230_s1 }
  0x30   : > { %p3742_p13 = scmp.ne.s32.totalorder %s4230_s1, %s3741_s12  ;;  %p3750_p5 = scmp.lt.s32.totalorder %s3741_s12, %s3741_s12 }
  0x32   : > { %p3744_p0 = pnand %p3742_p13, %p4253_p8  ;;  %p3751_p7 = por %p3750_p5, %p3749_p4 }
  0x34   : > { %p3745_p2 = pneg %p3744_p0 }
  0x36   : > { %p3752_p9 = pnand %p3751_p7, %p3745_p2 }
  0x38   : > { %3755 = shalt.err (!%p3752_p9)
}
  0x39   : > { %s4695_s17 = smov 128   ;;  %s4696_s14 = smov 8  }
  0x3a   : > { %3619 = dma.hbm_to_vmem [thread:$0]  (!%p4237_p6), %s4714_s16, 4096, %s4230_s1, [#allocation12], %s4695_s17, %s4695_s17, %s4696_s14  }
  0x3b   : > { %s4716_s5 = sld [smem:[#allocation35_spill]] }
  0x41   : > { %s3756_s12 = scalar_lea.hbm %s4716_s5, 2048 }
  0x42   : > { %p3757_p5 = scmp.ne.s32.totalorder %s4716_s5, %s3756_s12  ;;  %p3763_p12 = scmp.lt.u32.totalorder %s3756_s12, %s4716_s5 }
  0x44   : > { %p3759_p10 = pnand %p3757_p5, %p4253_p8 }
  0x46   : > { %p3760_p11 = pneg %p3759_p10 }
  0x48   : > { %p3765_p13 = pnand %p3763_p12, %p3760_p11 }
  0x4a   : > { %3768 = shalt.err (!%p3765_p13)
}
  0x4b   : > { %s3769_s1 = scalar_lea.vmem %s4241_s22, 2048  ;;  %p3777_p7 = scmp.lt.s32.totalorder %s4241_s22, %s4241_s22 }
  0x4c   : > { %p3770_p0 = scmp.ne.s32.totalorder %s4241_s22, %s3769_s1  ;;  %p3778_p9 = scmp.lt.s32.totalorder %s3769_s1, %s3769_s1 }
  0x4e   : > { %p3772_p2 = pnand %p3770_p0, %p4253_p8  ;;  %p3779_p5 = por %p3778_p9, %p3777_p7 }
  0x50   : > { %p3773_p4 = pneg %p3772_p2 }
  0x52   : > { %p3780_p10 = pnand %p3779_p5, %p3773_p4 }
  0x54   : > { %3783 = shalt.err (!%p3780_p10)
}
  0x55   : > { %3625 = dma.hbm_to_vmem [thread:$0]  (!%p4237_p6), %s4716_s5, 2048, %s4241_s22, [#allocation15], %s4695_s17, %s4695_s17, %s4696_s14  }
  0x56   : > { %s3784_s27 = scalar_lea.hbm %s4679_s9, 4096 }
  0x57   : > { %p3785_p11 = scmp.ne.s32.totalorder %s4679_s9, %s3784_s27  ;;  %p3791_p0 = scmp.lt.u32.totalorder %s3784_s27, %s4679_s9 }
  0x59   : > { %p3787_p12 = pnand %p3785_p11, %p4253_p8 }
  0x5b   : > { %p3788_p13 = pneg %p3787_p12 }
  0x5d   : > { %p3793_p2 = pnand %p3791_p0, %p3788_p13 }
  0x5f   : > { %3796 = shalt.err (!%p3793_p2)
}
  0x60   : > { %s3797_s1 = scalar_lea.vmem %s523_s0, 4096  ;;  %p3805_p5 = scmp.lt.s32.totalorder %s523_s0, %s523_s0 }
  0x61   : > { %p3798_p4 = scmp.ne.s32.totalorder %s523_s0, %s3797_s1  ;;  %p3806_p10 = scmp.lt.s32.totalorder %s3797_s1, %s3797_s1 }
  0x63   : > { %p3800_p7 = pnand %p3798_p4, %p4253_p8  ;;  %p3807_p3 = por %p3806_p10, %p3805_p5 }
  0x65   : > { %p3801_p9 = pneg %p3800_p7 }
  0x67   : > { %p3808_p1 = pnand %p3807_p3, %p3801_p9 }
  0x69   : > { %3811 = shalt.err (!%p3808_p1)
}
  0x6a   : > { %3631 = dma.hbm_to_vmem [thread:$0]  (!%p4237_p6), %s4679_s9, 4096, %s523_s0, [#allocation18], %s4695_s17, %s4695_s17, %s4696_s14  }
  0x6b   : > { %s4087_s4 = smov [#allocation20]   ;;  %s4088_s8 = smov [#allocation13]  }
  0x6c   : > { %s554_s6 = sshll.u32 %s4087_s4, 4  ;;  %s474_s27 = sshll.u32 %s4088_s8, 4  ;;  %s555_s6 = int_to_ptr.vmem [resolvable:$true] %s554_s6  ;;  %s475_s27 = int_to_ptr.vmem [resolvable:$true] %s474_s27 }
  0x6d   : > { %s3812_s23 = scalar_lea.hbm %s4683_s13, 4096 }
  0x6e   : > { %p3813_p1 = scmp.ne.s32.totalorder %s4683_s13, %s3812_s23  ;;  %p3819_p12 = scmp.lt.u32.totalorder %s3812_s23, %s4683_s13 }
  0x70   : > { %p3815_p3 = pnand %p3813_p1, %p4253_p8 }
  0x72   : > { %p3816_p11 = pneg %p3815_p3 }
  0x74   : > { %p3821_p13 = pnand %p3819_p12, %p3816_p11 }
  0x76   : > { %3824 = shalt.err (!%p3821_p13)
}
  0x77   : > { %s3825_s0 = scalar_lea.vmem %s555_s6, 4096  ;;  %p3833_p7 = scmp.lt.s32.totalorder %s555_s6, %s555_s6 }
  0x78   : > { %p3826_p0 = scmp.ne.s32.totalorder %s555_s6, %s3825_s0  ;;  %p3834_p9 = scmp.lt.s32.totalorder %s3825_s0, %s3825_s0 }
  0x7a   : > { %p3828_p2 = pnand %p3826_p0, %p4253_p8  ;;  %p3835_p5 = por %p3834_p9, %p3833_p7 }
  0x7c   : > { %p3829_p4 = pneg %p3828_p2 }
  0x7e   : > { %p3836_p10 = pnand %p3835_p5, %p3829_p4 }
  0x80   : > { %3839 = shalt.err (!%p3836_p10)
}
  0x81   : > { %3637 = dma.hbm_to_vmem [thread:$0]  (!%p4237_p6), %s4683_s13, 4096, %s555_s6, [#allocation21], %s4695_s17, %s4695_s17, %s4696_s14  }
  0x82   : > { %s3840_s19 = scalar_lea.hbm %s4673_s3, 4096 }
  0x83   : > { %p3841_p1 = scmp.ne.s32.totalorder %s4673_s3, %s3840_s19  ;;  %p3847_p12 = scmp.lt.u32.totalorder %s3840_s19, %s4673_s3 }
  0x85   : > { %p3843_p3 = pnand %p3841_p1, %p4253_p8 }
  0x87   : > { %p3844_p11 = pneg %p3843_p3 }
  0x89   : > { %p3849_p13 = pnand %p3847_p12, %p3844_p11 }
  0x8b   : > { %3852 = shalt.err (!%p3849_p13)
}
  0x8c   : > { %s3853_s22 = scalar_lea.vmem %s475_s27, 4096  ;;  %p3861_p7 = scmp.lt.s32.totalorder %s475_s27, %s475_s27 }
  0x8d   : > { %p3854_p0 = scmp.ne.s32.totalorder %s475_s27, %s3853_s22  ;;  %p3862_p9 = scmp.lt.s32.totalorder %s3853_s22, %s3853_s22 }
  0x8f   : > { %p3856_p2 = pnand %p3854_p0, %p4253_p8  ;;  %p3863_p5 = por %p3862_p9, %p3861_p7 }
  0x91   : > { %p3857_p4 = pneg %p3856_p2 }
  0x93   : > { %p3864_p10 = pnand %p3863_p5, %p3857_p4 }
  0x95   : > { %3867 = shalt.err (!%p3864_p10)
}
  0x96   : > { %3622 = dma.hbm_to_vmem [thread:$0]  (!%p4237_p6), %s4673_s3, 4096, %s475_s27, [#allocation12], %s4695_s17, %s4695_s17, %s4696_s14  }
  0x97   : > { %s4089_s5 = smov [#allocation16]   ;;  %s4090_s4 = smov [#allocation19]  }
  0x98   : > { %s506_s2 = sshll.u32 %s4089_s5, 4  ;;  %s538_s8 = sshll.u32 %s4090_s4, 4  ;;  %s507_s2 = int_to_ptr.vmem [resolvable:$true] %s506_s2  ;;  %s539_s8 = int_to_ptr.vmem [resolvable:$true] %s538_s8 }
  0x99   : > { %s3868_s23 = scalar_lea.hbm %s4677_s7, 4096 }
  0x9a   : > { %p3869_p1 = scmp.ne.s32.totalorder %s4677_s7, %s3868_s23  ;;  %p3875_p12 = scmp.lt.u32.totalorder %s3868_s23, %s4677_s7 }
  0x9c   : > { %p3871_p3 = pnand %p3869_p1, %p4253_p8 }
  0x9e   : > { %p3872_p11 = pneg %p3871_p3 }
  0xa0   : > { %p3877_p13 = pnand %p3875_p12, %p3872_p11 }
  0xa2   : > { %3880 = shalt.err (!%p3877_p13)
}
  0xa3   : > { %s3881_s27 = scalar_lea.vmem %s507_s2, 4096  ;;  %p3889_p7 = scmp.lt.s32.totalorder %s507_s2, %s507_s2 }
  0xa4   : > { %p3882_p0 = scmp.ne.s32.totalorder %s507_s2, %s3881_s27  ;;  %p3890_p9 = scmp.lt.s32.totalorder %s3881_s27, %s3881_s27 }
  0xa6   : > { %p3884_p2 = pnand %p3882_p0, %p4253_p8  ;;  %p3891_p5 = por %p3890_p9, %p3889_p7 }
  0xa8   : > { %p3885_p4 = pneg %p3884_p2 }
  0xaa   : > { %p3892_p10 = pnand %p3891_p5, %p3885_p4 }
  0xac   : > { %3895 = shalt.err (!%p3892_p10)
}
  0xad   : > { %3628 = dma.hbm_to_vmem [thread:$0]  (!%p4237_p6), %s4677_s7, 4096, %s507_s2, [#allocation15], %s4695_s17, %s4695_s17, %s4696_s14  }
  0xae   : > { %s3896_s21 = scalar_lea.hbm %s4681_s11, 4096 }
  0xaf   : > { %p3897_p1 = scmp.ne.s32.totalorder %s4681_s11, %s3896_s21  ;;  %p3903_p12 = scmp.lt.u32.totalorder %s3896_s21, %s4681_s11 }
  0xb1   : > { %p3899_p3 = pnand %p3897_p1, %p4253_p8 }
  0xb3   : > { %p3900_p11 = pneg %p3899_p3 }
  0xb5   : > { %p3905_p13 = pnand %p3903_p12, %p3900_p11 }
  0xb7   : > { %3908 = shalt.err (!%p3905_p13)
}
  0xb8   : > { %s3909_s6 = scalar_lea.vmem %s539_s8, 4096  ;;  %p3917_p7 = scmp.lt.s32.totalorder %s539_s8, %s539_s8 }
  0xb9   : > { %p3910_p0 = scmp.ne.s32.totalorder %s539_s8, %s3909_s6  ;;  %p3918_p9 = scmp.lt.s32.totalorder %s3909_s6, %s3909_s6 }
  0xbb   : > { %p3912_p2 = pnand %p3910_p0, %p4253_p8  ;;  %p3919_p5 = por %p3918_p9, %p3917_p7 }
  0xbd   : > { %p3913_p4 = pneg %p3912_p2 }
  0xbf   : > { %p3920_p10 = pnand %p3919_p5, %p3913_p4 }
  0xc1   : > { %3923 = shalt.err (!%p3920_p10)
}
  0xc2   : > { %3634 = dma.hbm_to_vmem [thread:$0]  (!%p4237_p6), %s4681_s11, 4096, %s539_s8, [#allocation18], %s4695_s17, %s4695_s17, %s4696_s14  }
  0xc3   : > { %s4091_s0 = smov [#allocation22]   ;;  %s3924_s21 = scalar_lea.hbm %s4685_s15, 2048 }
  0xc4   : > { %s570_s5 = sshll.u32 %s4091_s0, 4  ;;  %p3925_p1 = scmp.ne.s32.totalorder %s4685_s15, %s3924_s21  ;;  %s571_s5 = int_to_ptr.vmem [resolvable:$true] %s570_s5 }
  0xc5   : > { %p3931_p12 = scmp.lt.u32.totalorder %s3924_s21, %s4685_s15 }
  0xc6   : > { %p3927_p3 = pnand %p3925_p1, %p4253_p8 }
  0xc8   : > { %p3928_p11 = pneg %p3927_p3 }
  0xca   : > { %p3933_p13 = pnand %p3931_p12, %p3928_p11 }
  0xcc   : > { %3936 = shalt.err (!%p3933_p13)
}
  0xcd   : > { %s3937_s8 = scalar_lea.vmem %s571_s5, 2048  ;;  %p3945_p7 = scmp.lt.s32.totalorder %s571_s5, %s571_s5 }
  0xce   : > { %p3938_p0 = scmp.ne.s32.totalorder %s571_s5, %s3937_s8  ;;  %p3946_p9 = scmp.lt.s32.totalorder %s3937_s8, %s3937_s8 }
  0xd0   : > { %p3940_p2 = pnand %p3938_p0, %p4253_p8  ;;  %p3947_p5 = por %p3946_p9, %p3945_p7 }
  0xd2   : > { %p3941_p4 = pneg %p3940_p2 }
  0xd4   : > { %p3948_p10 = pnand %p3947_p5, %p3941_p4 }
  0xd6   : > { %3951 = shalt.err (!%p3948_p10)
}
  0xd7   : > { %3640 = dma.hbm_to_vmem [thread:$0]  (!%p4237_p6), %s4685_s15, 2048, %s571_s5, [#allocation21], %s4695_s17, %s4695_s17, %s4696_s14  }
  0xd8   : > { %s2338_s10 = sadd.s32 4294967294, %s4080_s29   ;;  %s49_s20 = sadd.s32 1, %s4076_s28 }
  0xd9   : > { %p51_p8 = scmp.ge.s32.totalorder %s49_s20, 2  ;;  %s58_s27 = sadd.s32 1, %s4068_s26 }
  0xda   : > { %p65_p1 = scmp.ne.s32.totalorder %s4068_s26, %s4064_s25  ;;  %p66_p3 = scmp.eq.s32.totalorder %s4080_s29, 0 }
  0xdb   : > { %s4748_s20 = smov (%p51_p8, %s49_s20), 0  ;;  %p71_p12 = scmp.ne.s32.totalorder %s4064_s25, %s4060_s24 }
  0xdc   : > { %p4438_p11 = por %p66_p3, %p65_p1  ;;  %s53_s5 = ssub.s32 %s4076_s28, %s4748_s20 }
  0xdd   : > { %s4718_s4 = sadd.s32 4294967295, %s4080_s29   ;;  %p56_p13 = scmp.eq.s32.totalorder %s53_s5, 0 }
  0xde   : > { %p433_p6 = scmp.eq.s32.totalorder %s4718_s4, 1  ;;  %p4719_p0 = scmp.ne.s32.totalorder %s4711_s30, 0 }
  0xdf   : > { %p439_p7 = scmp.eq.s32.totalorder %s2338_s10, 1  ;;  %p3657_p5 = scmp.lt.s32.totalorder %s4080_s29, 2 }
  0xe0   : > { %p4450_p2 = por %p4719_p0, %p71_p12  ;;  %p4454_p4 = por %p433_p6, %p65_p1 }
  0xe1   : > { %s4459_s23 = scalar_select %p56_p13, %s4068_s26, %s58_s27  }
  0xe2   : > { %s4721_s21 = scalar_select %p4454_p4, 1, 0 }
  0xe3   : > { %p4461_p9 = por %p439_p7, %p71_p12  ;;  %s587_s1 = sand.u32 1, %s4068_s26  }
  0xe4   : > { %s2376_s22 = sshll.u32 %s4076_s28, 8  ;;  %s2349_s8 = sshll.u32 %s587_s1, 4 }
  0xe5   : > { %s4722_s12 = scalar_select %p4461_p9, 1, 0 }
  0xe6   : > { %s4723_s5 = sld [smem:[#allocation31_spill]]  ;;  %s591_s10 = scalar_lea.vmem [#allocation8], %s2349_s8 }
  0xe7   : > { %s600_s27 = sshll.u32 %s591_s10, 4  ;;  %p4475_p10 = pnand %p3657_p5, %p4438_p11  ;;  %s4479_s27 = int_to_ptr.vmem [resolvable:$true] %s600_s27 }
  0xe8   : > { %s4481_s14 = scalar_lea.sflag [#allocation9], %s587_s1 }
  0xe9   : > { %p3954_p1 = pneg %p4475_p10 }
  0xec   : > { %s4471_s4 = scalar_lea.hbm %s4723_s5, %s2376_s22  ;;  %s3957_s8 = scalar_lea.hbm %s4723_s5, 512 }
  0xed   : > { %s3952_s6 = scalar_lea.hbm %s4471_s4, 256  ;;  %p3958_p11 = scmp.lt.u32.totalorder %s4471_s4, %s4723_s5 }
  0xee   : > { %p3953_p8 = scmp.ne.s32.totalorder %s4471_s4, %s3952_s6  ;;  %p3959_p6 = scmp.lt.u32.totalorder %s3957_s8, %s3952_s6 }
  0xef   : > { %p3961_p0 = scmp.lt.u32.totalorder %s3952_s6, %s4471_s4 }
  0xf0   : > { %p3955_p3 = pnand %p3954_p1, %p3953_p8  ;;  %p3960_p13 = por %p3959_p6, %p3958_p11 }
  0xf2   : > { %p3956_p12 = pneg %p3955_p3  ;;  %p3962_p7 = por %p3961_p0, %p3960_p13 }
  0xf4   : > { %p3963_p5 = pnand %p3962_p7, %p3956_p12 }
  0xf6   : > { %3966 = shalt.err (!%p3963_p5)
}
  0xf7   : > { %s3967_s1 = scalar_lea.vmem %s4479_s27, 256  ;;  %s4092_s22 = smov [#allocation8]  }
  0xf8   : > { %p3968_p8 = scmp.ne.s32.totalorder %s4479_s27, %s3967_s1  ;;  %s3972_s0 = sshll.u32 %s4092_s22, 4  ;;  %s3973_s0 = int_to_ptr.vmem [resolvable:$false] %s3972_s0 }
  0xf9   : > { %s3974_s2 = scalar_lea.vmem %s3973_s0, 512  ;;  %p3975_p4 = scmp.lt.s32.totalorder %s4479_s27, %s3973_s0 }
  0xfa   : > { %p3970_p3 = pnand %p3968_p8, %p3954_p1  ;;  %p3976_p11 = scmp.lt.s32.totalorder %s3974_s2, %s3967_s1 }
  0xfc   : > { %p3971_p9 = pneg %p3970_p3  ;;  %p3977_p6 = por %p3976_p11, %p3975_p4 }
  0xfe   : > { %p3978_p13 = pnand %p3977_p6, %p3971_p9 }
 0x100   : > { %3981 = shalt.err (!%p3978_p13)
}
 0x101   : > { %s4725_s6 = smov 8   ;;  %s4726_s8 = smov 128  }
 0x102   : > { %3644 = dma.hbm_to_vmem [thread:$0]  (!%p4475_p10), %s4471_s4, 256, %s4479_s27, %s4481_s14, %s4726_s8, %s4726_s8, %s4725_s6  }
 0x103   : > { %p4727_p1 = scmp.ne.s32.totalorder %s4712_s18, 0 }
 0x104   : > { %s4515_s10 = sand.u32 (!%p4727_p1), 1, %s4064_s25  }
 0x105   : > { %612 = sbr.rel (%p4727_p1) target bundleno = 1854 (0x73e), region = 88  ;;  %s2353_s1 = sshll.u32 (!%p4727_p1), %s4515_s10, 4 }
 0x106   : > { %s615_s22 = scalar_lea.sflag (!%p4727_p1), [#allocation9], %s4515_s10  ;;  %s4521_s17 = scalar_lea.vmem (!%p4727_p1), [#allocation8], %s2353_s1 }
 0x10c   : > { %4035 = dma.done.wait (%p4450_p2), %s615_s22, 256  }
 0x10d   : > { %4037 = vsyncadd (%p4450_p2), %s615_s22, 4294967040  ;;  %p4728_p4 = scmp.ne.s32.totalorder %s4711_s30, 0 }
 0x10f   : > { %4039 = dma.done.wait (%p4728_p4), [#allocation12], 8192  }
 0x110   : > { %4041 = vsyncadd (%p4728_p4), [#allocation12], 4294959104 }
 0x111   : > { %4043 = dma.done.wait (%p4728_p4), [#allocation15], 6144  }
 0x112   : > { %4045 = vsyncadd (%p4728_p4), [#allocation15], 4294961152 }
 0x113   : > { %4047 = dma.done.wait (%p4728_p4), [#allocation18], 8192  }
 0x114   : > { %4049 = vsyncadd (%p4728_p4), [#allocation18], 4294959104 }
 0x115   : > { %4051 = dma.done.wait (%p4728_p4), [#allocation21], 6144  }
 0x116   : > { %4053 = vsyncadd (%p4728_p4), [#allocation21], 4294961152  ;;  %v4093_v0 = vmov 0.0   ;;  %v738_v1 = vld [vmem:[#allocation11] sm:$0xff]  ;;  %v739_v2 = vld [vmem:[#allocation11 + $0x8] sm:$0xff]  ;;  %vm731_vm0 = vcmask 1040384  }
 0x117   : > { %709 = vst [vmem:[#allocation2] sm:$0x1] %v4093_v0  ;;  %710 = vst [vmem:[#allocation3] sm:$0x1] %v4093_v0  ;;  %v740_v3 = vld [vmem:[#allocation11 + $0x10] sm:$0xff]  ;;  %v3120_v4 = vpack.c.bf16 %v739_v2, %v738_v1  ;;  %v741_v5 = vld [vmem:[#allocation11 + $0x18] sm:$0xff] }
 0x118   : > { %1225 = vst [vmem:[#allocation4] sm:$0x3] %v4093_v0  ;;  %1226 = vst [vmem:[#allocation5] sm:$0x3] %v4093_v0  ;;  %v3124_v6 = vpack.c.bf16 %v741_v5, %v740_v3  ;;  %v742_v7 = vld [vmem:[#allocation11 + $0x20] sm:$0xff]  ;;  %v743_v8 = vld [vmem:[#allocation11 + $0x28] sm:$0xff] }
 0x119   : > { %1643 = vst [vmem:[#allocation6] sm:$0xf] %v4093_v0  ;;  %1644 = vst [vmem:[#allocation7] sm:$0xf] %v4093_v0  ;;  %3121 = vmatprep.subr.bf16.mxu0 %v3120_v4  ;;  %v3128_v9 = vpack.c.bf16 %v743_v8, %v742_v7  ;;  %v744_v10 = vld [vmem:[#allocation11 + $0x30] sm:$0xff]  ;;  %v745_v12 = vld [vmem:[#allocation11 + $0x38] sm:$0xff] }
 0x11a   : > { %3123 = vmatpush3.bf16.msra.mxu0 %v3120_v4  ;;  %v4544_v11 = vld [vmem:[%s4521_s17] sm:$0xff]  ;;  %v4547_v13 = vld [vmem:[%s4521_s17 + $0x8] sm:$0xff]  ;;  %v3132_v17 = vpack.c.bf16 %v745_v12, %v744_v10  ;;  %s4729_s14 = sld [smem:[#allocation33_spill]]  ;;  %s4730_s27 = sld [smem:[#allocation34_spill]]  ;;  %vm1247_vm1 = vcmask 1041408   ;;  %vm1665_vm2 = vcmask 1043456  }
 0x11b   : > { %3125 = vmatprep.subr.bf16.mxu0 %v3124_v6  ;;  %v732_v15 = vrot.slane %v4544_v11, 7  ;;  %v746_v18 = vld [vmem:[#allocation11 + $0x40] sm:$0xff]  ;;  %v747_v19 = vld [vmem:[#allocation11 + $0x48] sm:$0xff]  ;;  %v943_v22 = vld [vmem:[#allocation13 + $0x10] sm:$0xff]  ;;  %v733_v49 = vrot.slane %v4547_v13, 7  ;;  %s4731_s6 = sld [smem:[#allocation36_spill]] }
 0x11c   : > { %v941_v20 = vld [vmem:[#allocation13] sm:$0xff]  ;;  %v942_v21 = vld [vmem:[#allocation13 + $0x8] sm:$0xff]  ;;  %v944_v23 = vld [vmem:[#allocation13 + $0x18] sm:$0xff]  ;;  %v3136_v24 = vpack.c.bf16 %v747_v19, %v746_v18  ;;  %s4732_s17 = sld [smem:[#allocation37_spill]]  ;;  %s4735_s0 = sld [smem:[#allocation30_spill]] }
 0x11d   : > { %v748_v25 = vld [vmem:[#allocation11 + $0x50] sm:$0xff]  ;;  %v3184_v26 = vpack.c.bf16 %v942_v21, %v941_v20  ;;  %v3188_v27 = vpack.c.bf16 %v944_v23, %v943_v22  ;;  %v749_v28 = vld [vmem:[#allocation11 + $0x58] sm:$0xff]  ;;  %v945_v29 = vld [vmem:[#allocation13 + $0x20] sm:$0xff]  ;;  %v734_v54 = vsel %vm731_vm0, %v732_v15, %v733_v49  ;;  %s4736_s8 = sld [smem:[#allocation40_spill]]  ;;  %s4737_s30 = sld [smem:[#allocation41_spill]] }
 0x11e   : > { %v728_v14 = vld [vmem:[#allocation2] sm:$0x1]  ;;  %3127 = vmatpush3.bf16.msra.mxu0 %v3124_v6  ;;  %v946_v30 = vld [vmem:[#allocation13 + $0x28] sm:$0xff]  ;;  %v3140_v31 = vpack.c.bf16 %v749_v28, %v748_v25  ;;  %v750_v32 = vld [vmem:[#allocation11 + $0x60] sm:$0xff]  ;;  %s700_s18 = scalar_lea.vmem [#allocation23], %s2353_s1  ;;  %s4738_s2 = sld [smem:[#allocation42_spill]] }
 0x11f   : > { %1216 = vst [vmem:[#allocation2 - $0x7] sm:$0x80] %v4547_v13  ;;  %v737_v16 = vsel %vm731_vm0, %v728_v14, %v732_v15  ;;  %3129 = vmatprep.subr.bf16.mxu0 %v3128_v9  ;;  %3185 = vmatprep.subr.bf16.mxu1 %v3184_v26  ;;  %v3192_v33 = vpack.c.bf16 %v946_v30, %v945_v29  ;;  %v751_v34 = vld [vmem:[#allocation11 + $0x68] sm:$0xff]  ;;  %v947_v35 = vld [vmem:[#allocation13 + $0x30] sm:$0xff]  ;;  %v948_v36 = vld [vmem:[#allocation13 + $0x38] sm:$0xff]  ;;  %s2159_s1 = scalar_lea.sflag [#allocation10], %s4515_s10 }
 0x120   : > { %2662 = vmatprep.mubr.f32.mxu0 %v737_v16  ;;  %3187 = vmatpush3.bf16.msra.mxu1 %v3184_v26  ;;  %v3144_v37 = vpack.c.bf16 %v751_v34, %v750_v32  ;;  %v752_v38 = vld [vmem:[#allocation11 + $0x70] sm:$0xff]  ;;  %v3196_v39 = vpack.c.bf16 %v948_v36, %v947_v35  ;;  %v753_v40 = vld [vmem:[#allocation11 + $0x78] sm:$0xff]  ;;  %v949_v41 = vld [vmem:[#allocation13 + $0x40] sm:$0xff]  ;;  %p4739_p9 = scmp.ne.s32.totalorder %s4721_s21, 0 }
 0x121   : > { %3189 = vmatprep.subr.bf16.mxu1 %v3188_v27  ;;  %v950_v42 = vld [vmem:[#allocation13 + $0x48] sm:$0xff]  ;;  %v3148_v43 = vpack.c.bf16 %v753_v40, %v752_v38  ;;  %v712_v44 = vld [vmem:[#allocation11 + $0x80] sm:$0xff]  ;;  %v951_v47 = vld [vmem:[#allocation13 + $0x50] sm:$0xff] }
 0x122   : > { %3131 = vmatpush3.bf16.msra.mxu0 %v3128_v9  ;;  %v3200_v45 = vpack.c.bf16 %v950_v42, %v949_v41  ;;  %v713_v46 = vld [vmem:[#allocation11 + $0x88] sm:$0xff]  ;;  %v952_v48 = vld [vmem:[#allocation13 + $0x58] sm:$0xff]  ;;  %v714_v52 = vld [vmem:[#allocation11 + $0x90] sm:$0xff]  ;;  %s2377_s19 = sshll.u32 %s4735_s0, 8  ;;  %s4094_s0 = smov [#allocation23]  }
 0x123   : > { %3133 = vmatprep.subr.bf16.mxu0 %v3132_v17  ;;  %v3152_v50 = vpack.c.bf16 %v713_v46, %v712_v44  ;;  %v3204_v51 = vpack.c.bf16 %v952_v48, %v951_v47  ;;  %v715_v53 = vld [vmem:[#allocation11 + $0x98] sm:$0xff]  ;;  %v716_v56 = vld [vmem:[#allocation11 + $0xa0] sm:$0xff]  ;;  %v717_v57 = vld [vmem:[#allocation11 + $0xa8] sm:$0xff]  ;;  %s3986_s22 = sshll.u32 %s4094_s0, 4  ;;  %s3987_s22 = int_to_ptr.vmem [resolvable:$false] %s3986_s22 }
 0x124   : > { %3191 = vmatpush3.bf16.msra.mxu1 %v3188_v27  ;;  %v3156_v55 = vpack.c.bf16 %v715_v53, %v714_v52  ;;  %v3160_v58 = vpack.c.bf16 %v717_v57, %v716_v56  ;;  %v718_v59 = vld [vmem:[#allocation11 + $0xb0] sm:$0xff]  ;;  %v719_v60 = vld [vmem:[#allocation11 + $0xb8] sm:$0xff]  ;;  %v720_v62 = vld [vmem:[#allocation11 + $0xc0] sm:$0xff] }
 0x125   : > { %3193 = vmatprep.subr.bf16.mxu1 %v3192_v33  ;;  %v3164_v61 = vpack.c.bf16 %v719_v60, %v718_v59  ;;  %v721_v63 = vld [vmem:[#allocation11 + $0xc8] sm:$0xff]  ;;  %v722_v1 = vld [vmem:[#allocation11 + $0xd0] sm:$0xff]  ;;  %v723_v2 = vld [vmem:[#allocation11 + $0xd8] sm:$0xff] }
 0x126   : > { %3135 = vmatpush3.bf16.msra.mxu0 %v3132_v17  ;;  %v3168_v0 = vpack.c.bf16 %v721_v63, %v720_v62  ;;  %v3172_v3 = vpack.c.bf16 %v723_v2, %v722_v1  ;;  %v724_v4 = vld [vmem:[#allocation11 + $0xe0] sm:$0xff]  ;;  %v725_v5 = vld [vmem:[#allocation11 + $0xe8] sm:$0xff]  ;;  %v726_v7 = vld [vmem:[#allocation11 + $0xf0] sm:$0xff] }
 0x127   : > { %3137 = vmatprep.subr.bf16.mxu0 %v3136_v24  ;;  %v3176_v6 = vpack.c.bf16 %v725_v5, %v724_v4  ;;  %v727_v8 = vld [vmem:[#allocation11 + $0xf8] sm:$0xff]  ;;  %v953_v10 = vld [vmem:[#allocation13 + $0x60] sm:$0xff]  ;;  %v954_v12 = vld [vmem:[#allocation13 + $0x68] sm:$0xff] }
 0x128   : > { %3195 = vmatpush3.bf16.msra.mxu1 %v3192_v33  ;;  %v3180_v9 = vpack.c.bf16 %v727_v8, %v726_v7  ;;  %v3208_v14 = vpack.c.bf16 %v954_v12, %v953_v10  ;;  %v955_v15 = vld [vmem:[#allocation13 + $0x70] sm:$0xff]  ;;  %v956_v16 = vld [vmem:[#allocation13 + $0x78] sm:$0xff]  ;;  %v916_v18 = vld [vmem:[#allocation13 + $0x80] sm:$0xff] }
 0x129   : > { %3197 = vmatprep.subr.bf16.mxu1 %v3196_v39  ;;  %v3212_v17 = vpack.c.bf16 %v956_v16, %v955_v15  ;;  %v917_v19 = vld [vmem:[#allocation13 + $0x88] sm:$0xff]  ;;  %v1118_v21 = vld [vmem:[#allocation14] sm:$0xff]  ;;  %v1124_v29 = vld [vmem:[#allocation14 + $0x30] sm:$0xff] }
 0x12a   : > { %3139 = vmatpush3.bf16.msra.mxu0 %v3136_v24  ;;  %v3216_v20 = vpack.c.bf16 %v917_v19, %v916_v18  ;;  %v1119_v22 = vld [vmem:[#allocation14 + $0x8] sm:$0xff]  ;;  %v1121_v24 = vld [vmem:[#allocation14 + $0x18] sm:$0xff]  ;;  %v1122_v26 = vld [vmem:[#allocation14 + $0x20] sm:$0xff] }
 0x12b   : > { %3141 = vmatprep.subr.bf16.mxu0 %v3140_v31  ;;  %v3248_v23 = vpack.c.bf16 %v1119_v22, %v1118_v21  ;;  %v1123_v27 = vld [vmem:[#allocation14 + $0x28] sm:$0xff]  ;;  %v1125_v30 = vld [vmem:[#allocation14 + $0x38] sm:$0xff]  ;;  %v1126_v32 = vld [vmem:[#allocation14 + $0x40] sm:$0xff] }
 0x12c   : > { %3199 = vmatpush3.bf16.msra.mxu1 %v3196_v39  ;;  %v3256_v28 = vpack.c.bf16 %v1123_v27, %v1122_v26  ;;  %v1127_v33 = vld [vmem:[#allocation14 + $0x48] sm:$0xff]  ;;  %v1128_v35 = vld [vmem:[#allocation14 + $0x50] sm:$0xff]  ;;  %v1129_v36 = vld [vmem:[#allocation14 + $0x58] sm:$0xff] }
 0x12d   : > { %3201 = vmatprep.subr.bf16.mxu1 %v3200_v45  ;;  %v3264_v34 = vpack.c.bf16 %v1127_v33, %v1126_v32  ;;  %v1130_v38 = vld [vmem:[#allocation14 + $0x60] sm:$0xff]  ;;  %v1131_v39 = vld [vmem:[#allocation14 + $0x68] sm:$0xff]  ;;  %v1132_v41 = vld [vmem:[#allocation14 + $0x70] sm:$0xff] }
 0x12e   : > { %3143 = vmatpush3.bf16.msra.mxu0 %v3140_v31  ;;  %v3260_v31 = vpack.c.bf16 %v1125_v30, %v1124_v29  ;;  %v3272_v40 = vpack.c.bf16 %v1131_v39, %v1130_v38  ;;  %v1133_v42 = vld [vmem:[#allocation14 + $0x78] sm:$0xff]  ;;  %v2363_v44 = vld [vmem:[%s4729_s14] ss:$0 sm:$0xff]  ;;  %v932_v49 = vld [vmem:[#allocation3] sm:$0x1]  ;;  %s4733_s14 = sld [smem:[#allocation38_spill]] }
 0x12f   : > { %3145 = vmatprep.subr.bf16.mxu0 %v3144_v37  ;;  %v918_v53 = vld [vmem:[#allocation13 + $0x90] sm:$0xff]  ;;  %v921_v59 = vld [vmem:[#allocation13 + $0xa8] sm:$0xff]  ;;  %v923_v62 = vld [vmem:[#allocation13 + $0xb8] sm:$0xff] }
 0x130   : > { %3203 = vmatpush3.bf16.msra.mxu1 %v3200_v45  ;;  %v925_v1 = vld [vmem:[#allocation13 + $0xc8] sm:$0xff]  ;;  %v927_v4 = vld [vmem:[#allocation13 + $0xd8] sm:$0xff]  ;;  %v1266_v33 = vld [vmem:[#allocation16 + $0x60] sm:$0xff] }
 0x131   : > { %3205 = vmatprep.subr.bf16.mxu1 %v3204_v51  ;;  %v929_v7 = vld [vmem:[#allocation13 + $0xe8] sm:$0xff]  ;;  %v931_v10 = vld [vmem:[#allocation13 + $0xf8] sm:$0xff]  ;;  %v1228_v39 = vld [vmem:[#allocation16 + $0x80] sm:$0xff] }
 0x132   : > { %3147 = vmatpush3.bf16.msra.mxu0 %v3144_v37  ;;  %v3268_v37 = vpack.c.bf16 %v1129_v36, %v1128_v35  ;;  %v1255_v15 = vld [vmem:[#allocation16 + $0x8] sm:$0xff]  ;;  %v1257_v18 = vld [vmem:[#allocation16 + $0x18] sm:$0xff]  ;;  %v1268_v36 = vld [vmem:[#allocation16 + $0x70] sm:$0xff] }
 0x133   : > { %3149 = vmatprep.subr.bf16.mxu0 %v3148_v43  ;;  %v1259_v21 = vld [vmem:[#allocation16 + $0x28] sm:$0xff]  ;;  %v1265_v29 = vld [vmem:[#allocation16 + $0x58] sm:$0xff] }
 0x134   : > { %3207 = vmatpush3.bf16.msra.mxu1 %v3204_v51  ;;  %v1263_v26 = vld [vmem:[#allocation16 + $0x48] sm:$0xff] }
 0x135   : > { %3209 = vmatprep.subr.bf16.mxu1 %v3208_v14 }
 0x136   : > { %3151 = vmatpush3.bf16.msra.mxu0 %v3148_v43  ;;  %v3276_v43 = vpack.c.bf16 %v1133_v42, %v1132_v41  ;;  %v1457_v42 = vld [vmem:[#allocation17] sm:$0xff] }
 0x137   : > { %3153 = vmatprep.subr.bf16.mxu0 %v3152_v50 }
 0x138   : > { %3211 = vmatpush3.bf16.msra.mxu1 %v3208_v14  ;;  %v1254_v14 = vld [vmem:[#allocation16] sm:$0xff] }
 0x139   : > { %2663 = vmatmul.mubr.f32.vlgmr.msra.gmra.mrb[0].mxu0 %v734_v54  ;;  %3213 = vmatprep.subr.bf16.mxu1 %v3212_v17  ;;  %v919_v54 = vld [vmem:[#allocation13 + $0x98] sm:$0xff]  ;;  %v3280_v16 = vpack.c.bf16 %v1255_v15, %v1254_v14 }
 0x13a   : > { %3155 = vmatpush3.bf16.msra.mxu0 %v3152_v50  ;;  %2697 = vmatprep.mubr.f32.mxu0 %v4544_v11  ;;  %v3220_v57 = vpack.c.bf16 %v919_v54, %v918_v53  ;;  %v1465_v54 = vld [vmem:[#allocation17 + $0x40] sm:$0xff]  ;;  %v1231_v14 = vld [vmem:[#allocation16 + $0x98] sm:$0xff] }
 0x13b   : > { %3157 = vmatprep.subr.bf16.mxu0 %v3156_v55 }
 0x13c   : > { %3215 = vmatpush3.bf16.msra.mxu1 %v3212_v17  ;;  %v1256_v17 = vld [vmem:[#allocation16 + $0x10] sm:$0xff] }
 0x13d   : > { %3217 = vmatprep.subr.bf16.mxu1 %v3216_v20  ;;  %v3284_v19 = vpack.c.bf16 %v1257_v18, %v1256_v17 }
 0x13e   : > { %3159 = vmatpush3.bf16.msra.mxu0 %v3156_v55 }
 0x13f   : > { %3161 = vmatprep.subr.bf16.mxu0 %v3160_v58 }
 0x142   : > { %3163 = vmatpush3.bf16.msra.mxu0 %v3160_v58  ;;  %v920_v58 = vld [vmem:[#allocation13 + $0xa0] sm:$0xff] }
 0x143   : > { %3165 = vmatprep.subr.bf16.mxu0 %v3164_v61  ;;  %v3224_v60 = vpack.c.bf16 %v921_v59, %v920_v58  ;;  %v2364_v59 = vld [vmem:[%s4730_s27] ss:$0 sm:$0xff]  ;;  %s4734_s27 = sld [smem:[#allocation39_spill]] }
 0x146   : > { %3167 = vmatpush3.bf16.msra.mxu0 %v3164_v61  ;;  %v922_v61 = vld [vmem:[#allocation13 + $0xb0] sm:$0xff] }
 0x147   : > { %3169 = vmatprep.subr.bf16.mxu0 %v3168_v0  ;;  %v3228_v63 = vpack.c.bf16 %v923_v62, %v922_v61 }
 0x14a   : > { %3171 = vmatpush3.bf16.msra.mxu0 %v3168_v0  ;;  %v924_v0 = vld [vmem:[#allocation13 + $0xc0] sm:$0xff] }
 0x14b   : > { %3173 = vmatprep.subr.bf16.mxu0 %v3172_v3  ;;  %v3232_v2 = vpack.c.bf16 %v925_v1, %v924_v0 }
 0x14e   : > { %3175 = vmatpush3.bf16.msra.mxu0 %v3172_v3  ;;  %v926_v3 = vld [vmem:[#allocation13 + $0xd0] sm:$0xff] }
 0x14f   : > { %3177 = vmatprep.subr.bf16.mxu0 %v3176_v6  ;;  %v3236_v5 = vpack.c.bf16 %v927_v4, %v926_v3 }
 0x152   : > { %3179 = vmatpush3.bf16.msra.mxu0 %v3176_v6  ;;  %v928_v6 = vld [vmem:[#allocation13 + $0xe0] sm:$0xff] }
 0x153   : > { %3181 = vmatprep.subr.bf16.mxu0 %v3180_v9  ;;  %v3240_v8 = vpack.c.bf16 %v929_v7, %v928_v6  ;;  %v1244_v7 = vld [vmem:[#allocation4] sm:$0x3] }
 0x156   : > { %3183 = vmatpush3.bf16.msra.mxu0 %v3180_v9  ;;  %v930_v9 = vld [vmem:[#allocation13 + $0xf0] sm:$0xff] }
 0x157   : > { %3249 = vmatprep.subr.bf16.mxu0 %v3248_v23  ;;  %v3244_v12 = vpack.c.bf16 %v931_v10, %v930_v9 }
 0x159   : > { %2698 = vmatmul.mubr.f32.vlgmr.msra.gmra.mrb[0].mxu0 %v4547_v13 }
 0x15a   : > { %2802 = vmatprep.mubr.f32.mxu0 %v4544_v11  ;;  %3251 = vmatpush3.bf16.msra.mxu0 %v3248_v23  ;;  %v1120_v11 = vld [vmem:[#allocation14 + $0x10] sm:$0xff] }
 0x15b   : > { %v3252_v25 = vpack.c.bf16 %v1121_v24, %v1120_v11  ;;  %v1260_v23 = vld [vmem:[#allocation16 + $0x30] sm:$0xff]  ;;  %v1261_v11 = vld [vmem:[#allocation16 + $0x38] sm:$0xff] }
 0x15c   : > { %v3292_v24 = vpack.c.bf16 %v1261_v11, %v1260_v23  ;;  %v1235_v23 = vld [vmem:[#allocation16 + $0xb8] sm:$0xff] }
 0x15d   : > { %3253 = vmatprep.subr.bf16.mxu0 %v3252_v25 }
 0x15e   : > { %3255 = vmatpush3.bf16.msra.mxu0 %v3252_v25  ;;  %v1262_v25 = vld [vmem:[#allocation16 + $0x40] sm:$0xff] }
 0x15f   : > { %3257 = vmatprep.subr.bf16.mxu0 %v3256_v28  ;;  %v3296_v27 = vpack.c.bf16 %v1263_v26, %v1262_v25  ;;  %v1237_v25 = vld [vmem:[#allocation16 + $0xc8] sm:$0xff] }
 0x162   : > { %3259 = vmatpush3.bf16.msra.mxu0 %v3256_v28  ;;  %v1264_v28 = vld [vmem:[#allocation16 + $0x50] sm:$0xff] }
 0x163   : > { %3261 = vmatprep.subr.bf16.mxu0 %v3260_v31  ;;  %v3300_v30 = vpack.c.bf16 %v1265_v29, %v1264_v28  ;;  %v1239_v28 = vld [vmem:[#allocation16 + $0xd8] sm:$0xff] }
 0x166   : > { %3263 = vmatpush3.bf16.msra.mxu0 %v3260_v31 }
 0x167   : > { %3265 = vmatprep.subr.bf16.mxu0 %v3264_v34 }
 0x16a   : > { %3267 = vmatpush3.bf16.msra.mxu0 %v3264_v34  ;;  %v1267_v34 = vld [vmem:[#allocation16 + $0x68] sm:$0xff] }
 0x16b   : > { %3269 = vmatprep.subr.bf16.mxu0 %v3268_v37  ;;  %v3304_v35 = vpack.c.bf16 %v1267_v34, %v1266_v33  ;;  %v1242_v33 = vld [vmem:[#allocation16 + $0xf0] sm:$0xff]  ;;  %v1243_v34 = vld [vmem:[#allocation16 + $0xf8] sm:$0xff] }
 0x16e   : > { %3271 = vmatpush3.bf16.msra.mxu0 %v3268_v37  ;;  %v1269_v37 = vld [vmem:[#allocation16 + $0x78] sm:$0xff] }
 0x16f   : > { %3273 = vmatprep.subr.bf16.mxu0 %v3272_v40  ;;  %v3308_v38 = vpack.c.bf16 %v1269_v37, %v1268_v36  ;;  %v1469_v36 = vld [vmem:[#allocation17 + $0x60] sm:$0xff]  ;;  %v1470_v37 = vld [vmem:[#allocation17 + $0x68] sm:$0xff] }
 0x172   : > { %3275 = vmatpush3.bf16.msra.mxu0 %v3272_v40  ;;  %v1229_v40 = vld [vmem:[#allocation16 + $0x88] sm:$0xff] }
 0x173   : > { %3277 = vmatprep.subr.bf16.mxu0 %v3276_v43  ;;  %v3312_v41 = vpack.c.bf16 %v1229_v40, %v1228_v39  ;;  %v1471_v39 = vld [vmem:[#allocation17 + $0x70] sm:$0xff]  ;;  %v1472_v40 = vld [vmem:[#allocation17 + $0x78] sm:$0xff] }
 0x176   : > { %3279 = vmatpush3.bf16.msra.mxu0 %v3276_v43  ;;  %v1458_v43 = vld [vmem:[#allocation17 + $0x8] sm:$0xff] }
 0x179   : > { %2803 = vmatmul.mubr.f32.vlgmr.msra.gmra.mrb[2].mxu0 %v4547_v13 }
 0x22c   : > { %v2699_v45 = vpop.f32.mrb[0].mxu0 }
 0x22d   : > { %v912_v46 = vadd.f32 %v2699_v45, %v2363_v44  ;;  %v895_v47 = vpop.f32.mrb[1].mxu0  ;;  %v3344_v45 = vpack.c.bf16 %v1458_v43, %v1457_v42  ;;  %v1432_v42 = vld [vmem:[#allocation17 + $0x80] sm:$0xff]  ;;  %v1433_v43 = vld [vmem:[#allocation17 + $0x88] sm:$0xff] }
 0x22e   : > { %v911_v48 = vadd.f32 %v2363_v44, %v895_v47  ;;  %v1459_v44 = vld [vmem:[#allocation17 + $0x10] sm:$0xff] }
 0x22f   : > { %v914_v50 = vmax.f32 %v912_v46, 0.0  ;;  %v1460_v46 = vld [vmem:[#allocation17 + $0x18] sm:$0xff]  ;;  %3345 = vmatprep.subr.bf16.mxu0 %v3344_v45 }
 0x230   : > { %v913_v51 = vmax.f32 %v911_v48, 0.0  ;;  %v3348_v47 = vpack.c.bf16 %v1460_v46, %v1459_v44  ;;  %v1461_v48 = vld [vmem:[#allocation17 + $0x20] sm:$0xff]  ;;  %3347 = vmatpush3.bf16.msra.mxu0 %v3344_v45  ;;  %v3376_v44 = vpack.c.bf16 %v1433_v43, %v1432_v42  ;;  %v1673_v46 = vld [vmem:[#allocation19 + $0x8] sm:$0xff] }
 0x231   : > { %v936_v52 = vrot.slane %v914_v50, 7  ;;  %1217 = vst [vmem:[#allocation3 - $0x7] sm:$0x80] %v914_v50  ;;  %v1672_v45 = vld [vmem:[#allocation19] sm:$0xff] }
 0x232   : > { %v935_v55 = vrot.slane %v913_v51, 7  ;;  %3349 = vmatprep.subr.bf16.mxu0 %v3348_v47  ;;  %v1875_v43 = vld [vmem:[#allocation20] sm:$0xff] }
 0x234   : > { %v940_v56 = vsel %vm731_vm0, %v932_v49, %v935_v55  ;;  %v937_v13 = vsel %vm731_vm0, %v935_v55, %v936_v52  ;;  %v1462_v49 = vld [vmem:[#allocation17 + $0x28] sm:$0xff]  ;;  %v1464_v52 = vld [vmem:[#allocation17 + $0x38] sm:$0xff]  ;;  %3351 = vmatpush3.bf16.msra.mxu0 %v3348_v47  ;;  %v1674_v47 = vld [vmem:[#allocation19 + $0x10] sm:$0xff] }
 0x235   : > { %2732 = vmatprep.mubr.f32.mxu1 %v940_v56  ;;  %v1466_v55 = vld [vmem:[#allocation17 + $0x48] sm:$0xff] }
 0x236   : > { %2733 = vmatmul.mubr.f32.vlgmr.msra.gmra.mrb[0].mxu1 %v937_v13  ;;  %v3360_v56 = vpack.c.bf16 %v1466_v55, %v1465_v54  ;;  %v1467_v13 = vld [vmem:[#allocation17 + $0x50] sm:$0xff]  ;;  %v1679_v55 = vld [vmem:[#allocation19 + $0x38] sm:$0xff] }
 0x237   : > { %3219 = vmatpush3.bf16.msra.mxu1 %v3216_v20  ;;  %2767 = vmatprep.mubr.f32.mxu1 %v913_v51  ;;  %v1258_v20 = vld [vmem:[#allocation16 + $0x20] sm:$0xff]  ;;  %v1463_v51 = vld [vmem:[#allocation17 + $0x30] sm:$0xff] }
 0x238   : > { %3221 = vmatprep.subr.bf16.mxu1 %v3220_v57  ;;  %v3288_v22 = vpack.c.bf16 %v1259_v21, %v1258_v20  ;;  %v3356_v53 = vpack.c.bf16 %v1464_v52, %v1463_v51  ;;  %v1233_v20 = vld [vmem:[#allocation16 + $0xa8] sm:$0xff]  ;;  %v1676_v51 = vld [vmem:[#allocation19 + $0x20] sm:$0xff]  ;;  %v1678_v54 = vld [vmem:[#allocation19 + $0x30] sm:$0xff] }
 0x239   : > { %v1677_v52 = vld [vmem:[#allocation19 + $0x28] sm:$0xff] }
 0x23b   : > { %3223 = vmatpush3.bf16.msra.mxu1 %v3220_v57  ;;  %v1468_v57 = vld [vmem:[#allocation17 + $0x58] sm:$0xff] }
 0x23c   : > { %3225 = vmatprep.subr.bf16.mxu1 %v3224_v60  ;;  %v3364_v58 = vpack.c.bf16 %v1468_v57, %v1467_v13  ;;  %v1680_v13 = vld [vmem:[#allocation19 + $0x40] sm:$0xff]  ;;  %v1681_v57 = vld [vmem:[#allocation19 + $0x48] sm:$0xff] }
 0x23f   : > { %3227 = vmatpush3.bf16.msra.mxu1 %v3224_v60  ;;  %v2365_v60 = vld [vmem:[%s4731_s6] ss:$0 sm:$0xff]  ;;  %s4621_s6 = scalar_lea.hbm %s4738_s2, %s2377_s19 }
 0x240   : > { %3229 = vmatprep.subr.bf16.mxu1 %v3228_v63 }
 0x243   : > { %3231 = vmatpush3.bf16.msra.mxu1 %v3228_v63 }
 0x244   : > { %3233 = vmatprep.subr.bf16.mxu1 %v3232_v2 }
 0x247   : > { %3235 = vmatpush3.bf16.msra.mxu1 %v3232_v2 }
 0x248   : > { %3237 = vmatprep.subr.bf16.mxu1 %v3236_v5 }
 0x24b   : > { %3239 = vmatpush3.bf16.msra.mxu1 %v3236_v5 }
 0x24c   : > { %3241 = vmatprep.subr.bf16.mxu1 %v3240_v8  ;;  %v2804_v31 = vpop.f32.mrb[2].mxu0 }
 0x24d   : > { %v1207_v32 = vpop.f32.mrb[3].mxu0  ;;  %v1213_v0 = vadd.f32 %v2804_v31, %v2365_v60  ;;  %v1241_v31 = vld [vmem:[#allocation16 + $0xe8] sm:$0xff] }
 0x24e   : > { %v1208_v2 = vadd.f32 %v2365_v60, %v1207_v32 }
 0x24f   : > { %3243 = vmatpush3.bf16.msra.mxu1 %v3240_v8 }
 0x250   : > { %3245 = vmatprep.subr.bf16.mxu1 %v3244_v12 }
 0x253   : > { %3247 = vmatpush3.bf16.msra.mxu1 %v3244_v12  ;;  %v1230_v12 = vld [vmem:[#allocation16 + $0x90] sm:$0xff] }
 0x254   : > { %3281 = vmatprep.subr.bf16.mxu1 %v3280_v16  ;;  %v3316_v18 = vpack.c.bf16 %v1231_v14, %v1230_v12  ;;  %v1436_v14 = vld [vmem:[#allocation17 + $0xa0] sm:$0xff] }
 0x256   : > { %2768 = vmatmul.mubr.f32.vlgmr.msra.gmra.mrb[0].mxu1 %v914_v50  ;;  %v3352_v50 = vpack.c.bf16 %v1462_v49, %v1461_v48  ;;  %v3408_v48 = vpack.c.bf16 %v1673_v46, %v1672_v45  ;;  %v1675_v49 = vld [vmem:[#allocation19 + $0x18] sm:$0xff]  ;;  %v1877_v45 = vld [vmem:[#allocation20 + $0x10] sm:$0xff] }
 0x257   : > { %3283 = vmatpush3.bf16.msra.mxu1 %v3280_v16 }
 0x258   : > { %3285 = vmatprep.subr.bf16.mxu1 %v3284_v19  ;;  %3353 = vmatprep.subr.bf16.mxu0 %v3352_v50 }
 0x259   : > { %3355 = vmatpush3.bf16.msra.mxu0 %v3352_v50  ;;  %v3412_v50 = vpack.c.bf16 %v1675_v49, %v1674_v47  ;;  %v1878_v47 = vld [vmem:[#allocation20 + $0x18] sm:$0xff]  ;;  %v1879_v49 = vld [vmem:[#allocation20 + $0x20] sm:$0xff] }
 0x25a   : > { %3357 = vmatprep.subr.bf16.mxu0 %v3356_v53 }
 0x25b   : > { %3287 = vmatpush3.bf16.msra.mxu1 %v3284_v19  ;;  %v1232_v19 = vld [vmem:[#allocation16 + $0xa0] sm:$0xff] }
 0x25c   : > { %3289 = vmatprep.subr.bf16.mxu1 %v3288_v22  ;;  %v3320_v21 = vpack.c.bf16 %v1233_v20, %v1232_v19  ;;  %v1440_v20 = vld [vmem:[#allocation17 + $0xc0] sm:$0xff] }
 0x25d   : > { %3359 = vmatpush3.bf16.msra.mxu0 %v3356_v53  ;;  %v3416_v53 = vpack.c.bf16 %v1677_v52, %v1676_v51  ;;  %v1881_v52 = vld [vmem:[#allocation20 + $0x30] sm:$0xff] }
 0x25e   : > { %3361 = vmatprep.subr.bf16.mxu0 %v3360_v56 }
 0x25f   : > { %3291 = vmatpush3.bf16.msra.mxu1 %v3288_v22  ;;  %v1234_v22 = vld [vmem:[#allocation16 + $0xb0] sm:$0xff] }
 0x260   : > { %3293 = vmatprep.subr.bf16.mxu1 %v3292_v24  ;;  %v3324_v11 = vpack.c.bf16 %v1235_v23, %v1234_v22  ;;  %v1442_v23 = vld [vmem:[#allocation17 + $0xd0] sm:$0xff] }
 0x261   : > { %3363 = vmatpush3.bf16.msra.mxu0 %v3360_v56  ;;  %v3420_v56 = vpack.c.bf16 %v1679_v55, %v1678_v54  ;;  %v1883_v55 = vld [vmem:[#allocation20 + $0x40] sm:$0xff] }
 0x262   : > { %3365 = vmatprep.subr.bf16.mxu0 %v3364_v58 }
 0x263   : > { %3295 = vmatpush3.bf16.msra.mxu1 %v3292_v24  ;;  %v1236_v24 = vld [vmem:[#allocation16 + $0xc0] sm:$0xff] }
 0x264   : > { %3297 = vmatprep.subr.bf16.mxu1 %v3296_v27  ;;  %v3328_v26 = vpack.c.bf16 %v1237_v25, %v1236_v24  ;;  %v1444_v25 = vld [vmem:[#allocation17 + $0xe0] sm:$0xff] }
 0x265   : > { %3367 = vmatpush3.bf16.msra.mxu0 %v3364_v58  ;;  %v3424_v58 = vpack.c.bf16 %v1681_v57, %v1680_v13  ;;  %v1885_v57 = vld [vmem:[#allocation20 + $0x50] sm:$0xff] }
 0x267   : > { %3299 = vmatpush3.bf16.msra.mxu1 %v3296_v27  ;;  %v1238_v27 = vld [vmem:[#allocation16 + $0xd0] sm:$0xff] }
 0x268   : > { %3301 = vmatprep.subr.bf16.mxu1 %v3300_v30  ;;  %v3332_v29 = vpack.c.bf16 %v1239_v28, %v1238_v27  ;;  %v1446_v28 = vld [vmem:[#allocation17 + $0xf0] sm:$0xff] }
 0x26b   : > { %3303 = vmatpush3.bf16.msra.mxu1 %v3300_v30  ;;  %v1240_v30 = vld [vmem:[#allocation16 + $0xe0] sm:$0xff] }
 0x26c   : > { %3305 = vmatprep.subr.bf16.mxu1 %v3304_v35  ;;  %v3336_v32 = vpack.c.bf16 %v1241_v31, %v1240_v30  ;;  %v1682_v31 = vld [vmem:[#allocation19 + $0x50] sm:$0xff] }
 0x26f   : > { %3307 = vmatpush3.bf16.msra.mxu1 %v3304_v35  ;;  %v3340_v35 = vpack.c.bf16 %v1243_v34, %v1242_v33  ;;  %v1684_v34 = vld [vmem:[#allocation19 + $0x60] sm:$0xff] }
 0x270   : > { %3309 = vmatprep.subr.bf16.mxu1 %v3308_v38 }
 0x273   : > { %3311 = vmatpush3.bf16.msra.mxu1 %v3308_v38  ;;  %v3368_v38 = vpack.c.bf16 %v1470_v37, %v1469_v36  ;;  %v1686_v37 = vld [vmem:[#allocation19 + $0x70] sm:$0xff] }
 0x274   : > { %3313 = vmatprep.subr.bf16.mxu1 %v3312_v41 }
 0x275   : > { %3369 = vmatprep.subr.bf16.mxu0 %v3368_v38 }
 0x276   : > { %3371 = vmatpush3.bf16.msra.mxu0 %v3368_v38  ;;  %v1687_v38 = vld [vmem:[#allocation19 + $0x78] sm:$0xff] }
 0x329   : > { %v2769_v61 = vpop.f32.mrb[0].mxu1 }
 0x32a   : > { %v1115_v62 = vadd.f32 %v2769_v61, %v2364_v59  ;;  %v1098_v63 = vpop.f32.mrb[1].mxu1 }
 0x32b   : > { %v1114_v1 = vadd.f32 %v2364_v59, %v1098_v63  ;;  %v2366_v59 = vld [vmem:[%s4732_s17] ss:$0 sm:$0xff]  ;;  %s3988_s17 = scalar_lea.vmem %s3987_s22, 512 }
 0x32c   : > { %v1117_v3 = vmax.f32 %v1115_v62, 0.0 }
 0x32d   : > { %v1116_v4 = vmax.f32 %v1114_v1, 0.0 }
 0x32e   : > { %v1219_v5 = vadd.f32 %v1213_v0, %v1117_v3  ;;  %v1448_v0 = vld [vmem:[#allocation5] sm:$0x3] }
 0x32f   : > { %v1218_v6 = vadd.f32 %v1208_v2, %v1116_v4  ;;  %v1434_v4 = vld [vmem:[#allocation17 + $0x90] sm:$0xff] }
 0x330   : > { %v4573_v8 = vmax.f32 %v1219_v5, 0.0  ;;  %v1435_v5 = vld [vmem:[#allocation17 + $0x98] sm:$0xff] }
 0x331   : > { %v4575_v9 = vmax.f32 %v1218_v6, 0.0  ;;  %v3380_v12 = vpack.c.bf16 %v1435_v5, %v1434_v4  ;;  %v1662_v5 = vld [vmem:[#allocation6] sm:$0xf] }
 0x332   : > { %1634 = vst [vmem:[#allocation4 - $0x6] sm:$0xc0] %v4573_v8  ;;  %v1249_v10 = vrot.slane %v4573_v8, 6 }
 0x333   : > { %v1248_v15 = vrot.slane %v4575_v9, 6 }
 0x335   : > { %v1253_v16 = vsel %vm1247_vm1, %v1244_v7, %v1248_v15  ;;  %v1250_v17 = vsel %vm1247_vm1, %v1248_v15, %v1249_v10  ;;  %v1437_v15 = vld [vmem:[#allocation17 + $0xa8] sm:$0xff] }
 0x336   : > { %2837 = vmatprep.mubr.f32.mxu1 %v1253_v16  ;;  %v3384_v16 = vpack.c.bf16 %v1437_v15, %v1436_v14  ;;  %v1649_v14 = vld [vmem:[#allocation19 + $0x98] sm:$0xff] }
 0x337   : > { %2838 = vmatmul.mubr.f32.vlgmr.msra.gmra.mrb[2].mxu1 %v1250_v17  ;;  %v1438_v17 = vld [vmem:[#allocation17 + $0xb0] sm:$0xff] }
 0x338   : > { %3315 = vmatpush3.bf16.msra.mxu1 %v3312_v41  ;;  %2872 = vmatprep.mubr.f32.mxu1 %v4575_v9  ;;  %v3372_v41 = vpack.c.bf16 %v1472_v40, %v1471_v39  ;;  %v3436_v39 = vpack.c.bf16 %v1687_v38, %v1686_v37  ;;  %v1646_v40 = vld [vmem:[#allocation19 + $0x80] sm:$0xff]  ;;  %v2054_v37 = vld [vmem:[#allocation22 + $0x10] sm:$0xff]  ;;  %v2055_v38 = vld [vmem:[#allocation22 + $0x18] sm:$0xff] }
 0x339   : > { %3317 = vmatprep.subr.bf16.mxu1 %v3316_v18 }
 0x33a   : > { %3373 = vmatprep.subr.bf16.mxu0 %v3372_v41 }
 0x33b   : > { %3375 = vmatpush3.bf16.msra.mxu0 %v3372_v41  ;;  %v1647_v41 = vld [vmem:[#allocation19 + $0x88] sm:$0xff] }
 0x33c   : > { %3319 = vmatpush3.bf16.msra.mxu1 %v3316_v18  ;;  %3377 = vmatprep.subr.bf16.mxu0 %v3376_v44  ;;  %v1439_v18 = vld [vmem:[#allocation17 + $0xb8] sm:$0xff]  ;;  %v3440_v42 = vpack.c.bf16 %v1647_v41, %v1646_v40  ;;  %v2056_v40 = vld [vmem:[#allocation22 + $0x20] sm:$0xff]  ;;  %v2057_v41 = vld [vmem:[#allocation22 + $0x28] sm:$0xff] }
 0x33d   : > { %3321 = vmatprep.subr.bf16.mxu1 %v3320_v21  ;;  %v3388_v19 = vpack.c.bf16 %v1439_v18, %v1438_v17 }
 0x340   : > { %3323 = vmatpush3.bf16.msra.mxu1 %v3320_v21  ;;  %v1441_v21 = vld [vmem:[#allocation17 + $0xc8] sm:$0xff] }
 0x341   : > { %3325 = vmatprep.subr.bf16.mxu1 %v3324_v11  ;;  %v3392_v22 = vpack.c.bf16 %v1441_v21, %v1440_v20  ;;  %v1652_v20 = vld [vmem:[#allocation19 + $0xb0] sm:$0xff]  ;;  %v1653_v21 = vld [vmem:[#allocation19 + $0xb8] sm:$0xff] }
 0x344   : > { %3327 = vmatpush3.bf16.msra.mxu1 %v3324_v11  ;;  %v1443_v11 = vld [vmem:[#allocation17 + $0xd8] sm:$0xff] }
 0x345   : > { %3329 = vmatprep.subr.bf16.mxu1 %v3328_v26  ;;  %v3396_v24 = vpack.c.bf16 %v1443_v11, %v1442_v23  ;;  %v1654_v23 = vld [vmem:[#allocation19 + $0xc0] sm:$0xff]  ;;  %v1655_v11 = vld [vmem:[#allocation19 + $0xc8] sm:$0xff] }
 0x348   : > { %3331 = vmatpush3.bf16.msra.mxu1 %v3328_v26  ;;  %v1445_v26 = vld [vmem:[#allocation17 + $0xe8] sm:$0xff] }
 0x349   : > { %3333 = vmatprep.subr.bf16.mxu1 %v3332_v29  ;;  %v3400_v27 = vpack.c.bf16 %v1445_v26, %v1444_v25  ;;  %v1656_v25 = vld [vmem:[#allocation19 + $0xd0] sm:$0xff]  ;;  %v1657_v26 = vld [vmem:[#allocation19 + $0xd8] sm:$0xff] }
 0x34c   : > { %3335 = vmatpush3.bf16.msra.mxu1 %v3332_v29  ;;  %v1447_v29 = vld [vmem:[#allocation17 + $0xf8] sm:$0xff] }
 0x34d   : > { %3337 = vmatprep.subr.bf16.mxu1 %v3336_v32  ;;  %v3404_v30 = vpack.c.bf16 %v1447_v29, %v1446_v28  ;;  %v1658_v28 = vld [vmem:[#allocation19 + $0xe0] sm:$0xff]  ;;  %v1659_v29 = vld [vmem:[#allocation19 + $0xe8] sm:$0xff] }
 0x350   : > { %3339 = vmatpush3.bf16.msra.mxu1 %v3336_v32  ;;  %v1683_v32 = vld [vmem:[#allocation19 + $0x58] sm:$0xff] }
 0x351   : > { %3341 = vmatprep.subr.bf16.mxu1 %v3340_v35  ;;  %v3428_v33 = vpack.c.bf16 %v1683_v32, %v1682_v31  ;;  %v1660_v31 = vld [vmem:[#allocation19 + $0xf0] sm:$0xff]  ;;  %v1661_v32 = vld [vmem:[#allocation19 + $0xf8] sm:$0xff] }
 0x354   : > { %3343 = vmatpush3.bf16.msra.mxu1 %v3340_v35  ;;  %v1685_v35 = vld [vmem:[#allocation19 + $0x68] sm:$0xff] }
 0x355   : > { %3409 = vmatprep.subr.bf16.mxu1 %v3408_v48  ;;  %v3432_v36 = vpack.c.bf16 %v1685_v35, %v1684_v34  ;;  %v2052_v34 = vld [vmem:[#allocation22] sm:$0xff]  ;;  %v2053_v35 = vld [vmem:[#allocation22 + $0x8] sm:$0xff] }
 0x357   : > { %2873 = vmatmul.mubr.f32.vlgmr.msra.gmra.mrb[2].mxu1 %v4573_v8 }
 0x358   : > { %3411 = vmatpush3.bf16.msra.mxu1 %v3408_v48  ;;  %v3476_v48 = vpack.c.bf16 %v1878_v47, %v1877_v45  ;;  %v2061_v47 = vld [vmem:[#allocation22 + $0x48] sm:$0xff] }
 0x359   : > { %3413 = vmatprep.subr.bf16.mxu1 %v3412_v50 }
 0x35c   : > { %3415 = vmatpush3.bf16.msra.mxu1 %v3412_v50  ;;  %v1880_v50 = vld [vmem:[#allocation20 + $0x28] sm:$0xff] }
 0x35d   : > { %3417 = vmatprep.subr.bf16.mxu1 %v3416_v53  ;;  %v3480_v51 = vpack.c.bf16 %v1880_v50, %v1879_v49  ;;  %v2062_v49 = vld [vmem:[#allocation22 + $0x50] sm:$0xff]  ;;  %v2063_v50 = vld [vmem:[#allocation22 + $0x58] sm:$0xff] }
 0x360   : > { %3419 = vmatpush3.bf16.msra.mxu1 %v3416_v53  ;;  %v1882_v53 = vld [vmem:[#allocation20 + $0x38] sm:$0xff] }
 0x361   : > { %3421 = vmatprep.subr.bf16.mxu1 %v3420_v56  ;;  %v3484_v54 = vpack.c.bf16 %v1882_v53, %v1881_v52  ;;  %v2064_v52 = vld [vmem:[#allocation22 + $0x60] sm:$0xff]  ;;  %v2065_v53 = vld [vmem:[#allocation22 + $0x68] sm:$0xff] }
 0x364   : > { %3423 = vmatpush3.bf16.msra.mxu1 %v3420_v56  ;;  %v1884_v56 = vld [vmem:[#allocation20 + $0x48] sm:$0xff] }
 0x365   : > { %3425 = vmatprep.subr.bf16.mxu1 %v3424_v58  ;;  %v3488_v13 = vpack.c.bf16 %v1884_v56, %v1883_v55  ;;  %v2066_v55 = vld [vmem:[#allocation22 + $0x70] sm:$0xff]  ;;  %v2067_v56 = vld [vmem:[#allocation22 + $0x78] sm:$0xff] }
 0x368   : > { %3427 = vmatpush3.bf16.msra.mxu1 %v3424_v58  ;;  %v1886_v58 = vld [vmem:[#allocation20 + $0x58] sm:$0xff] }
 0x369   : > { %3429 = vmatprep.subr.bf16.mxu1 %v3428_v33 }
 0x36c   : > { %3431 = vmatpush3.bf16.msra.mxu1 %v3428_v33  ;;  %v3468_v33 = vpack.c.bf16 %v1661_v32, %v1660_v31  ;;  %v1863_v31 = vld [vmem:[#allocation20 + $0xe8] sm:$0xff] }
 0x36d   : > { %3433 = vmatprep.subr.bf16.mxu1 %v3432_v36 }
 0x370   : > { %3435 = vmatpush3.bf16.msra.mxu1 %v3432_v36  ;;  %v3536_v36 = vpack.c.bf16 %v2053_v35, %v2052_v34  ;;  %v1865_v34 = vld [vmem:[#allocation20 + $0xf8] sm:$0xff] }
 0x371   : > { %3437 = vmatprep.subr.bf16.mxu1 %v3436_v39 }
 0x374   : > { %3439 = vmatpush3.bf16.msra.mxu1 %v3436_v39  ;;  %v3540_v39 = vpack.c.bf16 %v2055_v38, %v2054_v37  ;;  %v2369_v38 = vld [vmem:[%s4736_s8] ss:$0 sm:$0xff] }
 0x375   : > { %3441 = vmatprep.subr.bf16.mxu1 %v3440_v42 }
 0x42a   : > { %v2874_v60 = vpop.f32.mrb[2].mxu1 }
 0x42b   : > { %v1428_v61 = vadd.f32 %v2874_v60, %v2366_v59  ;;  %v1411_v62 = vpop.f32.mrb[3].mxu1  ;;  %v2367_v60 = vld [vmem:[%s4733_s14] ss:$0 sm:$0xff]  ;;  %s2174_s14 = sshll.u32 %s700_s18, 4  ;;  %s4616_s14 = int_to_ptr.vmem [resolvable:$true] %s2174_s14 }
 0x42c   : > { %v1427_v63 = vadd.f32 %v2366_v59, %v1411_v62  ;;  %v3492_v59 = vpack.c.bf16 %v1886_v58, %v1885_v57  ;;  %v1887_v57 = vld [vmem:[#allocation20 + $0x60] sm:$0xff]  ;;  %v1888_v58 = vld [vmem:[#allocation20 + $0x68] sm:$0xff]  ;;  %s3982_s8 = scalar_lea.vmem %s4616_s14, 256  ;;  %p3989_p0 = scmp.lt.s32.totalorder %s4616_s14, %s3987_s22 }
 0x42d   : > { %v1430_v1 = vmax.f32 %v1428_v61, 0.0  ;;  %p3983_p2 = scmp.ne.s32.totalorder %s4616_s14, %s3982_s8  ;;  %p3990_p7 = scmp.lt.s32.totalorder %s3988_s17, %s3982_s8 }
 0x42e   : > { %v1429_v2 = vmax.f32 %v1427_v63, 0.0 }
 0x42f   : > { %v1452_v3 = vrot.slane %v1430_v1, 6  ;;  %1635 = vst [vmem:[#allocation5 - $0x6] sm:$0xc0] %v1430_v1  ;;  %p3984_p10 = pnand %p3983_p2, %p4739_p9  ;;  %p3991_p5 = por %p3990_p7, %p3989_p0 }
 0x430   : > { %v1451_v6 = vrot.slane %v1429_v2, 6 }
 0x431   : > { %p3985_p12 = pneg %p3984_p10 }
 0x432   : > { %v1456_v7 = vsel %vm1247_vm1, %v1448_v0, %v1451_v6  ;;  %v1453_v10 = vsel %vm1247_vm1, %v1451_v6, %v1452_v3 }
 0x433   : > { %2907 = vmatprep.mubr.f32.mxu0 %v1456_v7  ;;  %p3992_p8 = pnand %p3991_p5, %p3985_p12 }
 0x434   : > { %2908 = vmatmul.mubr.f32.vlgmr.msra.gmra.mrb[4].mxu0 %v1453_v10 }
 0x435   : > { %3379 = vmatpush3.bf16.msra.mxu0 %v3376_v44  ;;  %2942 = vmatprep.mubr.f32.mxu0 %v1429_v2  ;;  %v1876_v44 = vld [vmem:[#allocation20 + $0x8] sm:$0xff] }
 0x436   : > { %3381 = vmatprep.subr.bf16.mxu0 %v3380_v12  ;;  %v3472_v46 = vpack.c.bf16 %v1876_v44, %v1875_v43  ;;  %v2058_v43 = vld [vmem:[#allocation22 + $0x30] sm:$0xff]  ;;  %v2059_v44 = vld [vmem:[#allocation22 + $0x38] sm:$0xff] }
 0x437   : > { %v3548_v45 = vpack.c.bf16 %v2059_v44, %v2058_v43 }
 0x439   : > { %3383 = vmatpush3.bf16.msra.mxu0 %v3380_v12  ;;  %v1648_v12 = vld [vmem:[#allocation19 + $0x90] sm:$0xff] }
 0x43a   : > { %3385 = vmatprep.subr.bf16.mxu0 %v3384_v16  ;;  %v3444_v18 = vpack.c.bf16 %v1649_v14, %v1648_v12 }
 0x43d   : > { %3387 = vmatpush3.bf16.msra.mxu0 %v3384_v16 }
 0x43e   : > { %3389 = vmatprep.subr.bf16.mxu0 %v3388_v19 }
 0x441   : > { %3391 = vmatpush3.bf16.msra.mxu0 %v3388_v19 }
 0x442   : > { %3393 = vmatprep.subr.bf16.mxu0 %v3392_v22 }
 0x445   : > { %3395 = vmatpush3.bf16.msra.mxu0 %v3392_v22  ;;  %v3452_v22 = vpack.c.bf16 %v1653_v21, %v1652_v20  ;;  %v1855_v20 = vld [vmem:[#allocation20 + $0xa8] sm:$0xff] }
 0x446   : > { %3397 = vmatprep.subr.bf16.mxu0 %v3396_v24 }
 0x449   : > { %3399 = vmatpush3.bf16.msra.mxu0 %v3396_v24  ;;  %v3456_v24 = vpack.c.bf16 %v1655_v11, %v1654_v23  ;;  %v1857_v23 = vld [vmem:[#allocation20 + $0xb8] sm:$0xff] }
 0x44a   : > { %3401 = vmatprep.subr.bf16.mxu0 %v3400_v27 }
 0x44d   : > { %3403 = vmatpush3.bf16.msra.mxu0 %v3400_v27  ;;  %v3460_v27 = vpack.c.bf16 %v1657_v26, %v1656_v25  ;;  %v1859_v25 = vld [vmem:[#allocation20 + $0xc8] sm:$0xff] }
 0x44e   : > { %3405 = vmatprep.subr.bf16.mxu0 %v3404_v30 }
 0x451   : > { %3407 = vmatpush3.bf16.msra.mxu0 %v3404_v30  ;;  %v3464_v30 = vpack.c.bf16 %v1659_v29, %v1658_v28  ;;  %v1861_v28 = vld [vmem:[#allocation20 + $0xd8] sm:$0xff] }
 0x452   : > { %3473 = vmatprep.subr.bf16.mxu0 %v3472_v46 }
 0x454   : > { %2943 = vmatmul.mubr.f32.vlgmr.msra.gmra.mrb[4].mxu0 %v1430_v1 }
 0x455   : > { %3475 = vmatpush3.bf16.msra.mxu0 %v3472_v46  ;;  %v2060_v46 = vld [vmem:[#allocation22 + $0x40] sm:$0xff] }
 0x456   : > { %3477 = vmatprep.subr.bf16.mxu0 %v3476_v48 }
 0x459   : > { %3479 = vmatpush3.bf16.msra.mxu0 %v3476_v48  ;;  %v3552_v48 = vpack.c.bf16 %v2061_v47, %v2060_v46 }
 0x45a   : > { %3481 = vmatprep.subr.bf16.mxu0 %v3480_v51 }
 0x45d   : > { %3483 = vmatpush3.bf16.msra.mxu0 %v3480_v51  ;;  %v3556_v51 = vpack.c.bf16 %v2063_v50, %v2062_v49 }
 0x45e   : > { %3485 = vmatprep.subr.bf16.mxu0 %v3484_v54 }
 0x461   : > { %3487 = vmatpush3.bf16.msra.mxu0 %v3484_v54  ;;  %v3560_v54 = vpack.c.bf16 %v2065_v53, %v2064_v52 }
 0x462   : > { %3489 = vmatprep.subr.bf16.mxu0 %v3488_v13 }
 0x465   : > { %3491 = vmatpush3.bf16.msra.mxu0 %v3488_v13  ;;  %v3564_v13 = vpack.c.bf16 %v2067_v56, %v2066_v55 }
 0x466   : > { %3493 = vmatprep.subr.bf16.mxu0 %v3492_v59 }
 0x469   : > { %3495 = vmatpush3.bf16.msra.mxu0 %v3492_v59  ;;  %v3496_v59 = vpack.c.bf16 %v1888_v58, %v1887_v57 }
 0x46b   : > { %3497 = vmatprep.subr.bf16.mxu0 %v3496_v59 }
 0x46d   : > { %3499 = vmatpush3.bf16.msra.mxu0 %v3496_v59 }
 0x527   : > { %v2944_v61 = vpop.f32.mrb[4].mxu0 }
 0x528   : > { %v1631_v62 = vadd.f32 %v2944_v61, %v2367_v60  ;;  %v1614_v63 = vpop.f32.mrb[5].mxu0  ;;  %v1890_v61 = vld [vmem:[#allocation20 + $0x78] sm:$0xff] }
 0x529   : > { %v1630_v0 = vadd.f32 %v2367_v60, %v1614_v63  ;;  %v1889_v60 = vld [vmem:[#allocation20 + $0x70] sm:$0xff]  ;;  %v1850_v63 = vld [vmem:[#allocation20 + $0x80] sm:$0xff] }
 0x52a   : > { %v1633_v1 = vmax.f32 %v1631_v62, 0.0  ;;  %v3500_v62 = vpack.c.bf16 %v1890_v61, %v1889_v60 }
 0x52b   : > { %v1632_v2 = vmax.f32 %v1630_v0, 0.0  ;;  %v1851_v0 = vld [vmem:[#allocation20 + $0x88] sm:$0xff] }
 0x52c   : > { %v1637_v3 = vadd.f32 %v1633_v1, %v4573_v8  ;;  %v1650_v8 = vld [vmem:[#allocation19 + $0xa0] sm:$0xff]  ;;  %3501 = vmatprep.subr.bf16.mxu0 %v3500_v62  ;;  %v3504_v1 = vpack.c.bf16 %v1851_v0, %v1850_v63 }
 0x52d   : > { %v1636_v4 = vadd.f32 %v1632_v2, %v4575_v9  ;;  %v1651_v9 = vld [vmem:[#allocation19 + $0xa8] sm:$0xff]  ;;  %3503 = vmatpush3.bf16.msra.mxu0 %v3500_v62  ;;  %v2368_v2 = vld [vmem:[%s4734_s27] ss:$0 sm:$0xff] }
 0x52e   : > { %v4594_v6 = vmax.f32 %v1637_v3, 0.0  ;;  %v3448_v19 = vpack.c.bf16 %v1651_v9, %v1650_v8  ;;  %3505 = vmatprep.subr.bf16.mxu0 %v3504_v1 }
 0x52f   : > { %v1638_v7 = vmax.f32 %v1636_v4, 0.0 }
 0x530   : > { %2150 = vst [vmem:[#allocation6 - $0x4] sm:$0xf0] %v4594_v6  ;;  %v1667_v10 = vrot.slane %v4594_v6, 4 }
 0x531   : > { %v1666_v15 = vrot.slane %v1638_v7, 4 }
 0x533   : > { %v1671_v16 = vsel %vm1665_vm2, %v1662_v5, %v1666_v15  ;;  %v1668_v17 = vsel %vm1665_vm2, %v1666_v15, %v1667_v10  ;;  %v1852_v15 = vld [vmem:[#allocation20 + $0x90] sm:$0xff] }
 0x534   : > { %2977 = vmatprep.mubr.f32.mxu1 %v1671_v16  ;;  %v1853_v16 = vld [vmem:[#allocation20 + $0x98] sm:$0xff] }
 0x535   : > { %2978 = vmatmul.mubr.f32.vlgmr.msra.gmra.mrb[4].mxu1 %v1668_v17  ;;  %v3508_v9 = vpack.c.bf16 %v1853_v16, %v1852_v15 }
 0x536   : > { %3443 = vmatpush3.bf16.msra.mxu1 %v3440_v42  ;;  %3012 = vmatprep.mubr.f32.mxu1 %v1638_v7  ;;  %v3544_v42 = vpack.c.bf16 %v2057_v41, %v2056_v40 }
 0x537   : > { %3445 = vmatprep.subr.bf16.mxu1 %v3444_v18 }
 0x53a   : > { %3447 = vmatpush3.bf16.msra.mxu1 %v3444_v18 }
 0x53b   : > { %3449 = vmatprep.subr.bf16.mxu1 %v3448_v19 }
 0x53e   : > { %3451 = vmatpush3.bf16.msra.mxu1 %v3448_v19  ;;  %v1854_v19 = vld [vmem:[#allocation20 + $0xa0] sm:$0xff] }
 0x53f   : > { %3453 = vmatprep.subr.bf16.mxu1 %v3452_v22  ;;  %v3512_v21 = vpack.c.bf16 %v1855_v20, %v1854_v19 }
 0x542   : > { %3455 = vmatpush3.bf16.msra.mxu1 %v3452_v22  ;;  %v1856_v22 = vld [vmem:[#allocation20 + $0xb0] sm:$0xff] }
 0x543   : > { %3457 = vmatprep.subr.bf16.mxu1 %v3456_v24  ;;  %v3516_v11 = vpack.c.bf16 %v1857_v23, %v1856_v22 }
 0x546   : > { %3459 = vmatpush3.bf16.msra.mxu1 %v3456_v24  ;;  %v1858_v24 = vld [vmem:[#allocation20 + $0xc0] sm:$0xff] }
 0x547   : > { %3461 = vmatprep.subr.bf16.mxu1 %v3460_v27  ;;  %v3520_v26 = vpack.c.bf16 %v1859_v25, %v1858_v24 }
 0x54a   : > { %3463 = vmatpush3.bf16.msra.mxu1 %v3460_v27  ;;  %v1860_v27 = vld [vmem:[#allocation20 + $0xd0] sm:$0xff] }
 0x54b   : > { %3465 = vmatprep.subr.bf16.mxu1 %v3464_v30  ;;  %v3524_v29 = vpack.c.bf16 %v1861_v28, %v1860_v27 }
 0x54e   : > { %3467 = vmatpush3.bf16.msra.mxu1 %v3464_v30  ;;  %v1862_v30 = vld [vmem:[#allocation20 + $0xe0] sm:$0xff] }
 0x54f   : > { %3469 = vmatprep.subr.bf16.mxu1 %v3468_v33  ;;  %v3528_v32 = vpack.c.bf16 %v1863_v31, %v1862_v30 }
 0x552   : > { %3471 = vmatpush3.bf16.msra.mxu1 %v3468_v33  ;;  %v1864_v33 = vld [vmem:[#allocation20 + $0xf0] sm:$0xff] }
 0x553   : > { %3537 = vmatprep.subr.bf16.mxu1 %v3536_v36 }
 0x555   : > { %3013 = vmatmul.mubr.f32.vlgmr.msra.gmra.mrb[4].mxu1 %v4594_v6 }
 0x556   : > { %3539 = vmatpush3.bf16.msra.mxu1 %v3536_v36  ;;  %3117 = vmatprep.mubr.f32.mxu1 %v1638_v7  ;;  %v1866_v7 = vld [vmem:[#allocation7] sm:$0xf]  ;;  %v3532_v36 = vpack.c.bf16 %v1865_v34, %v1864_v33 }
 0x557   : > { %3541 = vmatprep.subr.bf16.mxu1 %v3540_v39 }
 0x55a   : > { %3543 = vmatpush3.bf16.msra.mxu1 %v3540_v39  ;;  %v2370_v39 = vld [vmem:[%s4737_s30] ss:$0 sm:$0xff] }
 0x55b   : > { %3545 = vmatprep.subr.bf16.mxu1 %v3544_v42 }
 0x55e   : > { %3547 = vmatpush3.bf16.msra.mxu1 %v3544_v42 }
 0x55f   : > { %3549 = vmatprep.subr.bf16.mxu1 %v3548_v45 }
 0x562   : > { %3551 = vmatpush3.bf16.msra.mxu1 %v3548_v45 }
 0x563   : > { %3553 = vmatprep.subr.bf16.mxu1 %v3552_v48 }
 0x566   : > { %3555 = vmatpush3.bf16.msra.mxu1 %v3552_v48 }
 0x567   : > { %3557 = vmatprep.subr.bf16.mxu1 %v3556_v51 }
 0x56a   : > { %3559 = vmatpush3.bf16.msra.mxu1 %v3556_v51 }
 0x56b   : > { %3561 = vmatprep.subr.bf16.mxu1 %v3560_v54 }
 0x56e   : > { %3563 = vmatpush3.bf16.msra.mxu1 %v3560_v54 }
 0x56f   : > { %3565 = vmatprep.subr.bf16.mxu1 %v3564_v13 }
 0x572   : > { %3567 = vmatpush3.bf16.msra.mxu1 %v3564_v13 }
 0x575   : > { %3118 = vmatmul.mubr.f32.vlgmr.msra.gmra.mrb[6].mxu1 %v4594_v6 }
 0x628   : > { %v3014_v3 = vpop.f32.mrb[4].mxu1 }
 0x629   : > { %v1846_v4 = vadd.f32 %v3014_v3, %v2368_v2  ;;  %v1829_v5 = vpop.f32.mrb[5].mxu1 }
 0x62a   : > { %v1845_v6 = vadd.f32 %v2368_v2, %v1829_v5 }
 0x62b   : > { %v1848_v10 = vmax.f32 %v1846_v4, 0.0 }
 0x62c   : > { %v1847_v12 = vmax.f32 %v1845_v6, 0.0 }
 0x62d   : > { %v1870_v14 = vrot.slane %v1848_v10, 4  ;;  %2151 = vst [vmem:[#allocation7 - $0x4] sm:$0xf0] %v1848_v10 }
 0x62e   : > { %v1869_v17 = vrot.slane %v1847_v12, 4 }
 0x630   : > { %v1874_v18 = vsel %vm1665_vm2, %v1866_v7, %v1869_v17  ;;  %v1871_v8 = vsel %vm1665_vm2, %v1869_v17, %v1870_v14 }
 0x631   : > { %3047 = vmatprep.mubr.f32.mxu0 %v1874_v18 }
 0x632   : > { %3048 = vmatmul.mubr.f32.vlgmr.msra.gmra.mrb[6].mxu0 %v1871_v8 }
 0x633   : > { %3507 = vmatpush3.bf16.msra.mxu0 %v3504_v1  ;;  %3082 = vmatprep.mubr.f32.mxu0 %v1847_v12 }
 0x634   : > { %3509 = vmatprep.subr.bf16.mxu0 %v3508_v9 }
 0x637   : > { %3511 = vmatpush3.bf16.msra.mxu0 %v3508_v9 }
 0x638   : > { %3513 = vmatprep.subr.bf16.mxu0 %v3512_v21 }
 0x63b   : > { %3515 = vmatpush3.bf16.msra.mxu0 %v3512_v21 }
 0x63c   : > { %3517 = vmatprep.subr.bf16.mxu0 %v3516_v11 }
 0x63f   : > { %3519 = vmatpush3.bf16.msra.mxu0 %v3516_v11 }
 0x640   : > { %3521 = vmatprep.subr.bf16.mxu0 %v3520_v26 }
 0x643   : > { %3523 = vmatpush3.bf16.msra.mxu0 %v3520_v26 }
 0x644   : > { %3525 = vmatprep.subr.bf16.mxu0 %v3524_v29 }
 0x647   : > { %3527 = vmatpush3.bf16.msra.mxu0 %v3524_v29 }
 0x648   : > { %v3119_v35 = vpop.f32.mrb[6].mxu1  ;;  %3529 = vmatprep.subr.bf16.mxu0 %v3528_v32 }
 0x649   : > { %v2141_v37 = vpop.f32.mrb[7].mxu1  ;;  %v2147_v44 = vadd.f32 %v3119_v35, %v2370_v39 }
 0x64a   : > { %v2142_v46 = vadd.f32 %v2370_v39, %v2141_v37 }
 0x64b   : > { %3531 = vmatpush3.bf16.msra.mxu0 %v3528_v32 }
 0x64c   : > { %3533 = vmatprep.subr.bf16.mxu0 %v3532_v36 }
 0x64f   : > { %3535 = vmatpush3.bf16.msra.mxu0 %v3532_v36 }
 0x652   : > { %3083 = vmatmul.mubr.f32.vlgmr.msra.gmra.mrb[6].mxu0 %v1848_v10 }
 0x725   : > { %v3084_v40 = vpop.f32.mrb[6].mxu0 }
 0x726   : > { %v2049_v41 = vadd.f32 %v3084_v40, %v2369_v38  ;;  %v2032_v42 = vpop.f32.mrb[7].mxu0 }
 0x727   : > { %v2048_v43 = vadd.f32 %v2369_v38, %v2032_v42 }
 0x728   : > { %v2051_v45 = vmax.f32 %v2049_v41, 0.0 }
 0x729   : > { %v2050_v47 = vmax.f32 %v2048_v43, 0.0 }
 0x72a   : > { %v2153_v48 = vadd.f32 %v2147_v44, %v2051_v45 }
 0x72b   : > { %v2152_v49 = vadd.f32 %v2142_v46, %v2050_v47 }
 0x72c   : > { %v2155_v50 = vmax.f32 %v2153_v48, 0.0 }
 0x72d   : > { %v2154_v51 = vmax.f32 %v2152_v49, 0.0 }
 0x72e   : > { %2157 = vst [vmem:[%s700_s18 + $0x8] sm:$0xff] %v2155_v50 }
 0x72f   : > { %2156 = vst [vmem:[%s700_s18] sm:$0xff] %v2154_v51 }
 0x730   : > { %3995 = shalt.err (!%p3992_p8)
}
 0x731   : > { %s3996_s30 = scalar_lea.hbm %s4621_s6, 256  ;;  %s4000_s4 = scalar_lea.hbm %s4738_s2, 512 }
 0x732   : > { %p3997_p3 = scmp.ne.s32.totalorder %s4621_s6, %s3996_s30  ;;  %p4001_p13 = scmp.lt.u32.totalorder %s4621_s6, %s4738_s2 }
 0x733   : > { %p4002_p1 = scmp.lt.u32.totalorder %s4000_s4, %s3996_s30  ;;  %p4004_p2 = scmp.lt.u32.totalorder %s3996_s30, %s4621_s6 }
 0x734   : > { %p3998_p11 = pnand %p3997_p3, %p4739_p9 }
 0x735   : > { %p4003_p4 = por %p4002_p1, %p4001_p13 }
 0x736   : > { %p3999_p6 = pneg %p3998_p11 }
 0x737   : > { %p4005_p10 = por %p4004_p2, %p4003_p4 }
 0x739   : > { %p4006_p12 = pnand %p4005_p10, %p3999_p6 }
 0x73b   : > { %4009 = shalt.err (!%p4006_p12)
}
 0x73c   : > { %s4095_s8 = smov 128   ;;  %s4096_s22 = smov 8  }
 0x73d   : > { %3614 = dma.vmem_to_hbm [thread:$0]  (%p4739_p9), %s4616_s14, 256, %s4621_s6, %s2159_s1, %s4095_s8, %s4095_s8, %s4096_s22  }
 0x73e PF: > { %s2189_s17 = sand.u32 1, %s4060_s24   ;;  %p4740_p0 = scmp.ne.s32.totalorder %s4722_s12, 0 }
 0x73f   : > { %p4741_p7 = scmp.ge.s32.totalorder %s4080_s29, 2  ;;  %s2190_s30 = scalar_lea.sflag [#allocation10], %s2189_s17 }
 0x741   : > { %p3646_p5 = pnand %p4741_p7, %p4740_p0 }
 0x743   : > { %4055 = dma.done.wait (!%p3646_p5), %s2190_s30, 256  }
 0x744   : > { %4057 = vsyncadd (!%p3646_p5), %s2190_s30, 4294967040  ;;  %s37_s29 = sadd.s32 1, %s4080_s29   ;;  %s4742_s24 = smov %s4064_s25 }
 0x745   : > { %p34_p8 = scmp.ge.s32.totalorder %s37_s29, 4   ;;  %s4743_s25 = smov %s4068_s26 }
 0x746   : > { %s4744_s26 = smov %s4459_s23  ;;  %s4745_s27 = smov %s4076_s28 }
 0x747   : > { %s4746_s28 = smov %s4748_s20  ;;  %36 = sbr.rel (!%p34_p8) target bundleno = 23 (0x17), region = 183 }
 0x74e   :  { %2195 = vsyncpa [#allocation9], 1 }
 0x74f   :  { %2197 = vsyncpa [#allocation9 + $0x1], 1 }
 0x750   :  { %2198 = vsyncpa [#allocation12], 1 }
 0x751   :  { %2199 = vsyncpa [#allocation15], 1 }
 0x752   :  { %2200 = vsyncpa [#allocation18], 1 }
 0x753   :  { %2201 = vsyncpa [#allocation21], 1 }
 0x754   :  { %2202 = vsyncpa [#allocation10], 1 }
 0x755   :  { %2204 = vsyncpa [#allocation10 + $0x1], 1 }

</bundles_post_ra>
